<compile_context>
chip_gen: v7x
topology: tpu7x:2x2x1
jax: 0.10.0
libtpu: 0.0.40
codegen_flags: <defaults>
</compile_context>

<pallas_src>
import functools

import jax
import jax.numpy as jnp
from jax import lax
from jax.experimental import pallas as pl
from jax.experimental.pallas import tpu as pltpu


def mha_kernel(xq_ref, xkv_ref, wqkv_ref, bqkv_ref, wfc_ref, bfc_ref,
               o_ref, q_scr, s_scr, acc_scr, *,
               num_heads, head_dim, scale, compute_dtype, approx_reciprocal):
    H, Dh = num_heads, head_dim
    D = H * Dh
    ki = pl.program_id(2)
    nk = pl.num_programs(2)

    # -------- per-(batch, q-tile) prologue: runs at the first key tile only --------
    @pl.when(ki == 0)
    def _():
        xq = xq_ref[0]                                                  # (tq, D)
        q = jnp.dot(xq.astype(compute_dtype),
                    wqkv_ref[:, :D].astype(compute_dtype),
                    preferred_element_type=jnp.float32) + bqkv_ref[:, :D]
        q = (q * scale).astype(compute_dtype)      # fold 1/sqrt(Dh) into q once
        for h in range(H):                         # per-head slabs -> dense reads per key tile
            q_scr[h] = q[:, h * Dh:(h + 1) * Dh]
        acc_scr[...] = jnp.zeros_like(acc_scr)

    # -------- every key tile: project k/v, per-head scores, softmax over heads --------
    xkv = xkv_ref[0]                                                    # (tk, D)
    kv = jnp.dot(xkv.astype(compute_dtype),
                 wqkv_ref[:, D:].astype(compute_dtype),
                 preferred_element_type=jnp.float32) + bqkv_ref[:, D:]  # (tk, 2D) f32
    kv = kv.astype(compute_dtype)

    # Scores written directly into preallocated VMEM scratch: no stack/concatenate,
    # and no explicit k transpose (contract q and k over Dh via dot_general).
    for h in range(H):
        k_h = kv[:, h * Dh:(h + 1) * Dh]                                # (tk, Dh)
        s_scr[h] = lax.dot_general(
            q_scr[h], k_h,
            dimension_numbers=(((1,), (1,)), ((), ())),
            preferred_element_type=jnp.float32)                         # (tq, tk)

    # Softmax over the HEAD axis (== dim=1 of the (B, H, N, N) tensor in PyTorch).
    s = s_scr[...]                                                      # (H, tq, tk) f32
    m = jnp.max(s, axis=0, keepdims=True)
    e = jnp.exp(s - m)
    denom = jnp.sum(e, axis=0, keepdims=True)                           # (1, tq, tk)
    p = (e * pl.reciprocal(denom, approx=approx_reciprocal)).astype(compute_dtype)

    # p @ v accumulated into the lane-dense (tq, D) accumulator.  Exact across key
    # tiles: the softmax denominator is over heads, local to each (q, k) pair.
    for h in range(H):
        v_h = kv[:, D + h * Dh:D + (h + 1) * Dh]                        # (tk, Dh)
        pv = jnp.dot(p[h], v_h, preferred_element_type=jnp.float32)     # (tq, Dh) f32
        sl = slice(h * Dh, (h + 1) * Dh)
        acc_scr[:, sl] = acc_scr[:, sl] + pv

    # -------- epilogue at the last key tile: output projection, lane-dense store --------
    @pl.when(ki == nk - 1)
    def _():
        out = jnp.dot(acc_scr[...].astype(compute_dtype),
                      wfc_ref[...].astype(compute_dtype),
                      preferred_element_type=jnp.float32) + bfc_ref[...]
        o_ref[0] = out.astype(o_ref.dtype)


def _pick_tile(n):
    # Prefer 256-wide tiles (v6e/v7x MXU is 2x256^2), then 128 (lane width / v5e MXU);
    # otherwise fall back to the full extent (e.g. the tiny test shape).
    for t in (256, 128):
        if n % t == 0:
            return t
    return n


def multi_head_attention(x, w_qkv, b_qkv, w_fc, b_fc, *, num_heads,
                         q_tile=None, k_tile=None, use_bf16_matmul=True):
    """Forward pass of the PyTorch MultiHeadAttention module (weights as (in, out))."""
    B, N, D = x.shape
    assert D % num_heads == 0, "emb_dim must be divisible by num_heads"
    Dh = D // num_heads
    scale = Dh ** (-0.5)

    # nn.Linear biases are 1-D; present them to the kernel as (1, out_features).
    b_qkv = jnp.asarray(b_qkv).reshape(1, 3 * D)
    b_fc = jnp.asarray(b_fc).reshape(1, D)

    tq = q_tile if q_tile is not None else _pick_tile(N)
    tk = k_tile if k_tile is not None else _pick_tile(N)
    assert N % tq == 0 and N % tk == 0, "tile sizes must divide the token count"

    compute_dtype = jnp.bfloat16 if use_bf16_matmul else jnp.float32

    kernel = functools.partial(
        mha_kernel, num_heads=num_heads, head_dim=Dh, scale=scale,
        compute_dtype=compute_dtype, approx_reciprocal=use_bf16_matmul)

    grid = (B, N // tq, N // tk)

    def build(single_buffer_weights):
        def w_spec(shape):
            idx = lambda b, qi, ki: (0,) * len(shape)
            if single_buffer_weights:
                # Constant index map -> double-buffering the weights is pure VMEM
                # waste (matters on v7x with 64 MiB VMEM / 32 MiB scoped default).
                return pl.BlockSpec(shape, idx, pipeline_mode=pl.Buffered(1))
            return pl.BlockSpec(shape, idx)

        return pl.pallas_call(
            kernel,
            out_shape=jax.ShapeDtypeStruct((B, N, D), x.dtype),
            grid_spec=pltpu.PrefetchScalarGridSpec(
                num_scalar_prefetch=0,
                grid=grid,
                in_specs=[
                    pl.BlockSpec((1, tq, D), lambda b, qi, ki: (b, qi, 0)),  # x: query rows
                    pl.BlockSpec((1, tk, D), lambda b, qi, ki: (b, ki, 0)),  # x: key/value rows
                    w_spec((D, 3 * D)),                                      # w_qkv
                    w_spec((1, 3 * D)),                                      # b_qkv
                    w_spec((D, D)),                                          # w_fc
                    w_spec((1, D)),                                          # b_fc
                ],
                out_specs=pl.BlockSpec((1, tq, D), lambda b, qi, ki: (b, qi, 0)),
                scratch_shapes=[
                    pltpu.VMEM((num_heads, tq, Dh), compute_dtype),   # pre-scaled q, per head
                    pltpu.VMEM((num_heads, tq, tk), jnp.float32),     # per-head scores
                    pltpu.VMEM((tq, D), jnp.float32),                 # attn @ v accumulator
                ]),
            compiler_params=pltpu.CompilerParams(
                dimension_semantics=("parallel", "parallel", "arbitrary"),
                vmem_limit_bytes=64 * 1024 * 1024),
        )

    args = (x, x, w_qkv, b_qkv, w_fc, b_fc)
    try:
        return build(single_buffer_weights=True)(*args)
    except Exception:
        # pl.Buffered(1) unsupported on this jax build -> default double buffering.
        return build(single_buffer_weights=False)(*args)


def mha_reference(x, w_qkv, b_qkv, w_fc, b_fc, *, num_heads):
    # Pure-JAX reference mirroring the PyTorch forward exactly.
    B, N, D = x.shape
    Dh = D // num_heads
    scale = Dh ** (-0.5)
    qkv = x @ w_qkv + b_qkv                                        # (B, N, 3D)
    qkv = qkv.reshape(B, N, 3, num_heads, Dh).transpose(2, 0, 3, 1, 4)
    q, k, v = qkv[0], qkv[1], qkv[2]                               # (B, H, N, Dh)
    attn_score = jnp.einsum('bhnd,bhmd->bhnm', q, k) * scale       # (B, H, N, N)
    attn_score = jax.nn.softmax(attn_score, axis=1)                # softmax over HEADS
    attn_weight = jnp.einsum('bhnm,bhmd->bhnd', attn_score, v)     # (B, H, N, Dh)
    attn_weight = attn_weight.transpose(0, 2, 1, 3).reshape(B, N, D)
    return attn_weight @ w_fc + b_fc


if __name__ == "__main__":
    B, N, D, H = 2, 8, 32, 4

    key = jax.random.PRNGKey(0)
    kx, kw1, kb1, kw2, kb2 = jax.random.split(key, 5)

    x = jax.random.normal(kx, (B, N, D), dtype=jnp.float32)
    # Linear weights stored as (in, out); biases 1-D like nn.Linear.bias.
    w_qkv = jax.random.normal(kw1, (D, 3 * D), dtype=jnp.float32) * 0.05
    b_qkv = jax.random.normal(kb1, (3 * D,), dtype=jnp.float32) * 0.05
    w_fc = jax.random.normal(kw2, (D, D), dtype=jnp.float32) * 0.05
    b_fc = jax.random.normal(kb2, (D,), dtype=jnp.float32) * 0.05

    ref = mha_reference(x, w_qkv, b_qkv, w_fc, b_fc, num_heads=H)

    # Exact path: f32 MXU operands, exact reciprocal.
    out_f32 = jax.block_until_ready(
        multi_head_attention(x, w_qkv, b_qkv, w_fc, b_fc, num_heads=H,
                             use_bf16_matmul=False))
    assert out_f32.shape == (B, N, D)
    assert jnp.allclose(out_f32, ref, atol=1e-4, rtol=1e-4), "f32 kernel mismatch"

    # Performance path: bf16 MXU operands, f32 accumulation (v6e/v7x friendly).
    out_bf16 = jax.block_until_ready(
        multi_head_attention(x, w_qkv, b_qkv, w_fc, b_fc, num_heads=H,
                             use_bf16_matmul=True))
    assert out_bf16.shape == (B, N, D)
    assert jnp.allclose(out_bf16, ref, atol=2e-2, rtol=2e-2), "bf16 kernel mismatch"

    print("KERNEL_OK")
</pallas_src>

<mosaic_0001>
module attributes {stable_mosaic.version = 11 : i64} {
  func.func @mha_kernel(%arg0: i32, %arg1: i32, %arg2: i32, %arg3: memref<1x8x32xf32, #tpu.memory_space<vmem>>, %arg4: memref<1x8x32xf32, #tpu.memory_space<vmem>>, %arg5: memref<32x96xf32, #tpu.memory_space<vmem>>, %arg6: memref<1x96xf32, #tpu.memory_space<vmem>>, %arg7: memref<32x32xf32, #tpu.memory_space<vmem>>, %arg8: memref<1x32xf32, #tpu.memory_space<vmem>>, %arg9: memref<1x8x32xf32, #tpu.memory_space<vmem>>, %arg10: memref<4x8x8xf32, #tpu.memory_space<vmem>>, %arg11: memref<4x8x8xf32, #tpu.memory_space<vmem>>, %arg12: memref<8x32xf32, #tpu.memory_space<vmem>>) attributes {dimension_semantics = [#tpu.dimension_semantics<parallel>, #tpu.dimension_semantics<parallel>, #tpu.dimension_semantics<arbitrary>], iteration_bounds = array<i64: 2, 1, 1>, scalar_prefetch = 0 : i64, scratch_operands = 3 : i64, tpu.core_type = #tpu.core_type<tc>, window_params = [{transform_indices = @transform_0, window_bounds = array<i64: 1, 8, 32>}, {transform_indices = @transform_1, window_bounds = array<i64: 1, 8, 32>}, {pipeline_mode = #tpu.pipeline_mode<synchronous>, transform_indices = @transform_2, window_bounds = array<i64: 32, 96>}, {pipeline_mode = #tpu.pipeline_mode<synchronous>, transform_indices = @transform_3, window_bounds = array<i64: 1, 96>}, {pipeline_mode = #tpu.pipeline_mode<synchronous>, transform_indices = @transform_4, window_bounds = array<i64: 32, 32>}, {pipeline_mode = #tpu.pipeline_mode<synchronous>, transform_indices = @transform_5, window_bounds = array<i64: 1, 32>}, {transform_indices = @transform_6, window_bounds = array<i64: 1, 8, 32>}]} {
    %c0_i32 = arith.constant 0 : i32
    %0 = arith.cmpi eq, %arg2, %c0_i32 : i32
    %1 = arith.extui %0 : i1 to i32
    %c0_i32_0 = arith.constant 0 : i32
    %2 = arith.cmpi ne, %1, %c0_i32_0 : i32
    scf.if %2 {
      %c0_55 = arith.constant 0 : index
      %c0_56 = arith.constant 0 : index
      %c0_57 = arith.constant 0 : index
      %80 = vector.load %arg3[%c0_55, %c0_56, %c0_57] : memref<1x8x32xf32, #tpu.memory_space<vmem>>, vector<1x8x32xf32>
      %81 = vector.shape_cast %80 : vector<1x8x32xf32> to vector<8x32xf32>
      %c0_58 = arith.constant 0 : index
      %c0_59 = arith.constant 0 : index
      %82 = vector.load %arg5[%c0_58, %c0_59] : memref<32x96xf32, #tpu.memory_space<vmem>>, vector<32x32xf32>
      %cst_60 = arith.constant dense<0.000000e+00> : vector<8x32xf32>
      %83 = tpu.matmul %81, %82, %cst_60 {dimension_numbers = #tpu.dot_dimension_numbers<[1], [0], [0], [1], [0, 0, 1, 1], [], []>} : vector<8x32xf32>, vector<32x32xf32>, vector<8x32xf32> -> vector<8x32xf32>
      %c0_61 = arith.constant 0 : index
      %c0_62 = arith.constant 0 : index
      %84 = vector.load %arg6[%c0_61, %c0_62] : memref<1x96xf32, #tpu.memory_space<vmem>>, vector<1x32xf32>
      %85 = vector.broadcast %84 : vector<1x32xf32> to vector<8x32xf32>
      %86 = arith.addf %83, %85 : vector<8x32xf32>
      %cst_63 = arith.constant 0.353553385 : f32
      %87 = vector.broadcast %cst_63 : f32 to vector<8x32xf32>
      %88 = arith.mulf %86, %87 : vector<8x32xf32>
      %89 = vector.extract_strided_slice %88 {offsets = [0, 0], sizes = [8, 8], strides = [1, 1]} : vector<8x32xf32> to vector<8x8xf32>
      %c0_64 = arith.constant 0 : index
      %c0_65 = arith.constant 0 : index
      %c0_66 = arith.constant 0 : index
      %90 = vector.load %arg10[%c0_64, %c0_65, %c0_66] : memref<4x8x8xf32, #tpu.memory_space<vmem>>, vector<1x8x8xf32>
      %91 = vector.shape_cast %90 : vector<1x8x8xf32> to vector<8x8xf32>
      %92 = vector.shape_cast %89 : vector<8x8xf32> to vector<1x8x8xf32>
      tpu.vector_store %arg10[%c0_64, %c0_65, %c0_66], %92 {strides = array<i32>} : memref<4x8x8xf32, #tpu.memory_space<vmem>>, vector<1x8x8xf32>,
      %93 = vector.extract_strided_slice %88 {offsets = [0, 8], sizes = [8, 8], strides = [1, 1]} : vector<8x32xf32> to vector<8x8xf32>
      %c1_67 = arith.constant 1 : index
      %c0_68 = arith.constant 0 : index
      %c0_69 = arith.constant 0 : index
      %94 = vector.load %arg10[%c1_67, %c0_68, %c0_69] : memref<4x8x8xf32, #tpu.memory_space<vmem>>, vector<1x8x8xf32>
      %95 = vector.shape_cast %94 : vector<1x8x8xf32> to vector<8x8xf32>
      %96 = vector.shape_cast %93 : vector<8x8xf32> to vector<1x8x8xf32>
      tpu.vector_store %arg10[%c1_67, %c0_68, %c0_69], %96 {strides = array<i32>} : memref<4x8x8xf32, #tpu.memory_space<vmem>>, vector<1x8x8xf32>,
      %97 = vector.extract_strided_slice %88 {offsets = [0, 16], sizes = [8, 8], strides = [1, 1]} : vector<8x32xf32> to vector<8x8xf32>
      %c2_70 = arith.constant 2 : index
      %c0_71 = arith.constant 0 : index
      %c0_72 = arith.constant 0 : index
      %98 = vector.load %arg10[%c2_70, %c0_71, %c0_72] : memref<4x8x8xf32, #tpu.memory_space<vmem>>, vector<1x8x8xf32>
      %99 = vector.shape_cast %98 : vector<1x8x8xf32> to vector<8x8xf32>
      %100 = vector.shape_cast %97 : vector<8x8xf32> to vector<1x8x8xf32>
      tpu.vector_store %arg10[%c2_70, %c0_71, %c0_72], %100 {strides = array<i32>} : memref<4x8x8xf32, #tpu.memory_space<vmem>>, vector<1x8x8xf32>,
      %101 = vector.extract_strided_slice %88 {offsets = [0, 24], sizes = [8, 8], strides = [1, 1]} : vector<8x32xf32> to vector<8x8xf32>
      %c3_73 = arith.constant 3 : index
      %c0_74 = arith.constant 0 : index
      %c0_75 = arith.constant 0 : index
      %102 = vector.load %arg10[%c3_73, %c0_74, %c0_75] : memref<4x8x8xf32, #tpu.memory_space<vmem>>, vector<1x8x8xf32>
      %103 = vector.shape_cast %102 : vector<1x8x8xf32> to vector<8x8xf32>
      %104 = vector.shape_cast %101 : vector<8x8xf32> to vector<1x8x8xf32>
      tpu.vector_store %arg10[%c3_73, %c0_74, %c0_75], %104 {strides = array<i32>} : memref<4x8x8xf32, #tpu.memory_space<vmem>>, vector<1x8x8xf32>,
      %cst_76 = arith.constant 0.000000e+00 : f32
      %105 = vector.broadcast %cst_76 : f32 to vector<8x32xf32>
      %c0_77 = arith.constant 0 : index
      %c0_78 = arith.constant 0 : index
      %106 = vector.load %arg12[%c0_77, %c0_78] : memref<8x32xf32, #tpu.memory_space<vmem>>, vector<8x32xf32>
      tpu.vector_store %arg12[%c0_77, %c0_78], %105 {strides = array<i32>} : memref<8x32xf32, #tpu.memory_space<vmem>>, vector<8x32xf32>,
    } else {
    }
    %c0 = arith.constant 0 : index
    %c0_1 = arith.constant 0 : index
    %c0_2 = arith.constant 0 : index
    %3 = vector.load %arg4[%c0, %c0_1, %c0_2] : memref<1x8x32xf32, #tpu.memory_space<vmem>>, vector<1x8x32xf32>
    %4 = vector.shape_cast %3 : vector<1x8x32xf32> to vector<8x32xf32>
    %c0_3 = arith.constant 0 : index
    %c32 = arith.constant 32 : index
    %5 = vector.load %arg5[%c0_3, %c32] : memref<32x96xf32, #tpu.memory_space<vmem>>, vector<32x64xf32>
    %cst = arith.constant dense<0.000000e+00> : vector<8x64xf32>
    %6 = tpu.matmul %4, %5, %cst {dimension_numbers = #tpu.dot_dimension_numbers<[1], [0], [0], [1], [0, 0, 1, 1], [], []>} : vector<8x32xf32>, vector<32x64xf32>, vector<8x64xf32> -> vector<8x64xf32>
    %c0_4 = arith.constant 0 : index
    %c32_5 = arith.constant 32 : index
    %7 = vector.load %arg6[%c0_4, %c32_5] : memref<1x96xf32, #tpu.memory_space<vmem>>, vector<1x64xf32>
    %8 = vector.broadcast %7 : vector<1x64xf32> to vector<8x64xf32>
    %9 = arith.addf %6, %8 : vector<8x64xf32>
    %10 = vector.extract_strided_slice %9 {offsets = [0, 0], sizes = [8, 8], strides = [1, 1]} : vector<8x64xf32> to vector<8x8xf32>
    %c0_6 = arith.constant 0 : index
    %c0_7 = arith.constant 0 : index
    %c0_8 = arith.constant 0 : index
    %11 = vector.load %arg10[%c0_6, %c0_7, %c0_8] : memref<4x8x8xf32, #tpu.memory_space<vmem>>, vector<1x8x8xf32>
    %12 = vector.shape_cast %11 : vector<1x8x8xf32> to vector<8x8xf32>
    %cst_9 = arith.constant dense<0.000000e+00> : vector<8x8xf32>
    %13 = tpu.matmul %12, %10, %cst_9 {dimension_numbers = #tpu.dot_dimension_numbers<[1], [1], [0], [0], [0, 0, 1, 0], [], []>} : vector<8x8xf32>, vector<8x8xf32>, vector<8x8xf32> -> vector<8x8xf32>
    %c0_10 = arith.constant 0 : index
    %c0_11 = arith.constant 0 : index
    %c0_12 = arith.constant 0 : index
    %14 = vector.load %arg11[%c0_10, %c0_11, %c0_12] : memref<4x8x8xf32, #tpu.memory_space<vmem>>, vector<1x8x8xf32>
    %15 = vector.shape_cast %14 : vector<1x8x8xf32> to vector<8x8xf32>
    %16 = vector.shape_cast %13 : vector<8x8xf32> to vector<1x8x8xf32>
    tpu.vector_store %arg11[%c0_10, %c0_11, %c0_12], %16 {strides = array<i32>} : memref<4x8x8xf32, #tpu.memory_space<vmem>>, vector<1x8x8xf32>,
    %17 = vector.extract_strided_slice %9 {offsets = [0, 8], sizes = [8, 8], strides = [1, 1]} : vector<8x64xf32> to vector<8x8xf32>
    %c1 = arith.constant 1 : index
    %c0_13 = arith.constant 0 : index
    %c0_14 = arith.constant 0 : index
    %18 = vector.load %arg10[%c1, %c0_13, %c0_14] : memref<4x8x8xf32, #tpu.memory_space<vmem>>, vector<1x8x8xf32>
    %19 = vector.shape_cast %18 : vector<1x8x8xf32> to vector<8x8xf32>
    %cst_15 = arith.constant dense<0.000000e+00> : vector<8x8xf32>
    %20 = tpu.matmul %19, %17, %cst_15 {dimension_numbers = #tpu.dot_dimension_numbers<[1], [1], [0], [0], [0, 0, 1, 0], [], []>} : vector<8x8xf32>, vector<8x8xf32>, vector<8x8xf32> -> vector<8x8xf32>
    %c1_16 = arith.constant 1 : index
    %c0_17 = arith.constant 0 : index
    %c0_18 = arith.constant 0 : index
    %21 = vector.load %arg11[%c1_16, %c0_17, %c0_18] : memref<4x8x8xf32, #tpu.memory_space<vmem>>, vector<1x8x8xf32>
    %22 = vector.shape_cast %21 : vector<1x8x8xf32> to vector<8x8xf32>
    %23 = vector.shape_cast %20 : vector<8x8xf32> to vector<1x8x8xf32>
    tpu.vector_store %arg11[%c1_16, %c0_17, %c0_18], %23 {strides = array<i32>} : memref<4x8x8xf32, #tpu.memory_space<vmem>>, vector<1x8x8xf32>,
    %24 = vector.extract_strided_slice %9 {offsets = [0, 16], sizes = [8, 8], strides = [1, 1]} : vector<8x64xf32> to vector<8x8xf32>
    %c2 = arith.constant 2 : index
    %c0_19 = arith.constant 0 : index
    %c0_20 = arith.constant 0 : index
    %25 = vector.load %arg10[%c2, %c0_19, %c0_20] : memref<4x8x8xf32, #tpu.memory_space<vmem>>, vector<1x8x8xf32>
    %26 = vector.shape_cast %25 : vector<1x8x8xf32> to vector<8x8xf32>
    %cst_21 = arith.constant dense<0.000000e+00> : vector<8x8xf32>
    %27 = tpu.matmul %26, %24, %cst_21 {dimension_numbers = #tpu.dot_dimension_numbers<[1], [1], [0], [0], [0, 0, 1, 0], [], []>} : vector<8x8xf32>, vector<8x8xf32>, vector<8x8xf32> -> vector<8x8xf32>
    %c2_22 = arith.constant 2 : index
    %c0_23 = arith.constant 0 : index
    %c0_24 = arith.constant 0 : index
    %28 = vector.load %arg11[%c2_22, %c0_23, %c0_24] : memref<4x8x8xf32, #tpu.memory_space<vmem>>, vector<1x8x8xf32>
    %29 = vector.shape_cast %28 : vector<1x8x8xf32> to vector<8x8xf32>
    %30 = vector.shape_cast %27 : vector<8x8xf32> to vector<1x8x8xf32>
    tpu.vector_store %arg11[%c2_22, %c0_23, %c0_24], %30 {strides = array<i32>} : memref<4x8x8xf32, #tpu.memory_space<vmem>>, vector<1x8x8xf32>,
    %31 = vector.extract_strided_slice %9 {offsets = [0, 24], sizes = [8, 8], strides = [1, 1]} : vector<8x64xf32> to vector<8x8xf32>
    %c3 = arith.constant 3 : index
    %c0_25 = arith.constant 0 : index
    %c0_26 = arith.constant 0 : index
    %32 = vector.load %arg10[%c3, %c0_25, %c0_26] : memref<4x8x8xf32, #tpu.memory_space<vmem>>, vector<1x8x8xf32>
    %33 = vector.shape_cast %32 : vector<1x8x8xf32> to vector<8x8xf32>
    %cst_27 = arith.constant dense<0.000000e+00> : vector<8x8xf32>
    %34 = tpu.matmul %33, %31, %cst_27 {dimension_numbers = #tpu.dot_dimension_numbers<[1], [1], [0], [0], [0, 0, 1, 0], [], []>} : vector<8x8xf32>, vector<8x8xf32>, vector<8x8xf32> -> vector<8x8xf32>
    %c3_28 = arith.constant 3 : index
    %c0_29 = arith.constant 0 : index
    %c0_30 = arith.constant 0 : index
    %35 = vector.load %arg11[%c3_28, %c0_29, %c0_30] : memref<4x8x8xf32, #tpu.memory_space<vmem>>, vector<1x8x8xf32>
    %36 = vector.shape_cast %35 : vector<1x8x8xf32> to vector<8x8xf32>
    %37 = vector.shape_cast %34 : vector<8x8xf32> to vector<1x8x8xf32>
    tpu.vector_store %arg11[%c3_28, %c0_29, %c0_30], %37 {strides = array<i32>} : memref<4x8x8xf32, #tpu.memory_space<vmem>>, vector<1x8x8xf32>,
    %c0_31 = arith.constant 0 : index
    %c0_32 = arith.constant 0 : index
    %c0_33 = arith.constant 0 : index
    %38 = vector.load %arg11[%c0_31, %c0_32, %c0_33] : memref<4x8x8xf32, #tpu.memory_space<vmem>>, vector<4x8x8xf32>
    %cst_34 = arith.constant dense<0xFF800000> : vector<8x8xf32>
    %39 = vector.multi_reduction <maximumf>, %38, %cst_34 [0] : vector<4x8x8xf32> to vector<8x8xf32>
    %40 = vector.shape_cast %39 : vector<8x8xf32> to vector<1x8x8xf32>
    %41 = vector.broadcast %40 : vector<1x8x8xf32> to vector<4x8x8xf32>
    %42 = arith.subf %38, %41 : vector<4x8x8xf32>
    %43 = math.exp %42 : vector<4x8x8xf32>
    %cst_35 = arith.constant dense<0.000000e+00> : vector<8x8xf32>
    %44 = vector.multi_reduction <add>, %43, %cst_35 [0] : vector<4x8x8xf32> to vector<8x8xf32>
    %45 = vector.shape_cast %44 : vector<8x8xf32> to vector<1x8x8xf32>
    %46 = tpu.reciprocal %45 : vector<1x8x8xf32> -> vector<1x8x8xf32>
    %47 = vector.broadcast %46 : vector<1x8x8xf32> to vector<4x8x8xf32>
    %48 = arith.mulf %43, %47 : vector<4x8x8xf32>
    %49 = vector.extract_strided_slice %9 {offsets = [0, 32], sizes = [8, 8], strides = [1, 1]} : vector<8x64xf32> to vector<8x8xf32>
    %50 = vector.extract_strided_slice %48 {offsets = [0, 0, 0], sizes = [1, 8, 8], strides = [1, 1, 1]} : vector<4x8x8xf32> to vector<1x8x8xf32>
    %51 = vector.shape_cast %50 : vector<1x8x8xf32> to vector<8x8xf32>
    %cst_36 = arith.constant dense<0.000000e+00> : vector<8x8xf32>
    %52 = tpu.matmul %51, %49, %cst_36 {dimension_numbers = #tpu.dot_dimension_numbers<[1], [0], [0], [1], [0, 0, 1, 1], [], []>} : vector<8x8xf32>, vector<8x8xf32>, vector<8x8xf32> -> vector<8x8xf32>
    %c0_37 = arith.constant 0 : index
    %c0_38 = arith.constant 0 : index
    %53 = vector.load %arg12[%c0_37, %c0_38] : memref<8x32xf32, #tpu.memory_space<vmem>>, vector<8x8xf32>
    %54 = arith.addf %53, %52 : vector<8x8xf32>
    %c0_39 = arith.constant 0 : index
    %c0_40 = arith.constant 0 : index
    %55 = vector.load %arg12[%c0_39, %c0_40] : memref<8x32xf32, #tpu.memory_space<vmem>>, vector<8x8xf32>
    tpu.vector_store %arg12[%c0_39, %c0_40], %54 {strides = array<i32>} : memref<8x32xf32, #tpu.memory_space<vmem>>, vector<8x8xf32>,
    %56 = vector.extract_strided_slice %9 {offsets = [0, 40], sizes = [8, 8], strides = [1, 1]} : vector<8x64xf32> to vector<8x8xf32>
    %57 = vector.extract_strided_slice %48 {offsets = [1, 0, 0], sizes = [1, 8, 8], strides = [1, 1, 1]} : vector<4x8x8xf32> to vector<1x8x8xf32>
    %58 = vector.shape_cast %57 : vector<1x8x8xf32> to vector<8x8xf32>
    %cst_41 = arith.constant dense<0.000000e+00> : vector<8x8xf32>
    %59 = tpu.matmul %58, %56, %cst_41 {dimension_numbers = #tpu.dot_dimension_numbers<[1], [0], [0], [1], [0, 0, 1, 1], [], []>} : vector<8x8xf32>, vector<8x8xf32>, vector<8x8xf32> -> vector<8x8xf32>
    %c0_42 = arith.constant 0 : index
    %c8 = arith.constant 8 : index
    %60 = vector.load %arg12[%c0_42, %c8] : memref<8x32xf32, #tpu.memory_space<vmem>>, vector<8x8xf32>
    %61 = arith.addf %60, %59 : vector<8x8xf32>
    %c0_43 = arith.constant 0 : index
    %c8_44 = arith.constant 8 : index
    %62 = vector.load %arg12[%c0_43, %c8_44] : memref<8x32xf32, #tpu.memory_space<vmem>>, vector<8x8xf32>
    tpu.vector_store %arg12[%c0_43, %c8_44], %61 {strides = array<i32>} : memref<8x32xf32, #tpu.memory_space<vmem>>, vector<8x8xf32>,
    %63 = vector.extract_strided_slice %9 {offsets = [0, 48], sizes = [8, 8], strides = [1, 1]} : vector<8x64xf32> to vector<8x8xf32>
    %64 = vector.extract_strided_slice %48 {offsets = [2, 0, 0], sizes = [1, 8, 8], strides = [1, 1, 1]} : vector<4x8x8xf32> to vector<1x8x8xf32>
    %65 = vector.shape_cast %64 : vector<1x8x8xf32> to vector<8x8xf32>
    %cst_45 = arith.constant dense<0.000000e+00> : vector<8x8xf32>
    %66 = tpu.matmul %65, %63, %cst_45 {dimension_numbers = #tpu.dot_dimension_numbers<[1], [0], [0], [1], [0, 0, 1, 1], [], []>} : vector<8x8xf32>, vector<8x8xf32>, vector<8x8xf32> -> vector<8x8xf32>
    %c0_46 = arith.constant 0 : index
    %c16 = arith.constant 16 : index
    %67 = vector.load %arg12[%c0_46, %c16] : memref<8x32xf32, #tpu.memory_space<vmem>>, vector<8x8xf32>
    %68 = arith.addf %67, %66 : vector<8x8xf32>
    %c0_47 = arith.constant 0 : index
    %c16_48 = arith.constant 16 : index
    %69 = vector.load %arg12[%c0_47, %c16_48] : memref<8x32xf32, #tpu.memory_space<vmem>>, vector<8x8xf32>
    tpu.vector_store %arg12[%c0_47, %c16_48], %68 {strides = array<i32>} : memref<8x32xf32, #tpu.memory_space<vmem>>, vector<8x8xf32>,
    %70 = vector.extract_strided_slice %9 {offsets = [0, 56], sizes = [8, 8], strides = [1, 1]} : vector<8x64xf32> to vector<8x8xf32>
    %71 = vector.extract_strided_slice %48 {offsets = [3, 0, 0], sizes = [1, 8, 8], strides = [1, 1, 1]} : vector<4x8x8xf32> to vector<1x8x8xf32>
    %72 = vector.shape_cast %71 : vector<1x8x8xf32> to vector<8x8xf32>
    %cst_49 = arith.constant dense<0.000000e+00> : vector<8x8xf32>
    %73 = tpu.matmul %72, %70, %cst_49 {dimension_numbers = #tpu.dot_dimension_numbers<[1], [0], [0], [1], [0, 0, 1, 1], [], []>} : vector<8x8xf32>, vector<8x8xf32>, vector<8x8xf32> -> vector<8x8xf32>
    %c0_50 = arith.constant 0 : index
    %c24 = arith.constant 24 : index
    %74 = vector.load %arg12[%c0_50, %c24] : memref<8x32xf32, #tpu.memory_space<vmem>>, vector<8x8xf32>
    %75 = arith.addf %74, %73 : vector<8x8xf32>
    %c0_51 = arith.constant 0 : index
    %c24_52 = arith.constant 24 : index
    %76 = vector.load %arg12[%c0_51, %c24_52] : memref<8x32xf32, #tpu.memory_space<vmem>>, vector<8x8xf32>
    tpu.vector_store %arg12[%c0_51, %c24_52], %75 {strides = array<i32>} : memref<8x32xf32, #tpu.memory_space<vmem>>, vector<8x8xf32>,
    %c0_i32_53 = arith.constant 0 : i32
    %77 = arith.cmpi eq, %arg2, %c0_i32_53 : i32
    %78 = arith.extui %77 : i1 to i32
    %c0_i32_54 = arith.constant 0 : i32
    %79 = arith.cmpi ne, %78, %c0_i32_54 : i32
    scf.if %79 {
      %c0_55 = arith.constant 0 : index
      %c0_56 = arith.constant 0 : index
      %80 = vector.load %arg12[%c0_55, %c0_56] : memref<8x32xf32, #tpu.memory_space<vmem>>, vector<8x32xf32>
      %c0_57 = arith.constant 0 : index
      %c0_58 = arith.constant 0 : index
      %81 = vector.load %arg7[%c0_57, %c0_58] : memref<32x32xf32, #tpu.memory_space<vmem>>, vector<32x32xf32>
      %cst_59 = arith.constant dense<0.000000e+00> : vector<8x32xf32>
      %82 = tpu.matmul %80, %81, %cst_59 {dimension_numbers = #tpu.dot_dimension_numbers<[1], [0], [0], [1], [0, 0, 1, 1], [], []>} : vector<8x32xf32>, vector<32x32xf32>, vector<8x32xf32> -> vector<8x32xf32>
      %c0_60 = arith.constant 0 : index
      %c0_61 = arith.constant 0 : index
      %83 = vector.load %arg8[%c0_60, %c0_61] : memref<1x32xf32, #tpu.memory_space<vmem>>, vector<1x32xf32>
      %84 = vector.broadcast %83 : vector<1x32xf32> to vector<8x32xf32>
      %85 = arith.addf %82, %84 : vector<8x32xf32>
      %c0_62 = arith.constant 0 : index
      %c0_63 = arith.constant 0 : index
      %c0_64 = arith.constant 0 : index
      %86 = vector.load %arg9[%c0_62, %c0_63, %c0_64] : memref<1x8x32xf32, #tpu.memory_space<vmem>>, vector<1x8x32xf32>
      %87 = vector.shape_cast %86 : vector<1x8x32xf32> to vector<8x32xf32>
      %88 = vector.shape_cast %85 : vector<8x32xf32> to vector<1x8x32xf32>
      tpu.vector_store %arg9[%c0_62, %c0_63, %c0_64], %88 {strides = array<i32>} : memref<1x8x32xf32, #tpu.memory_space<vmem>>, vector<1x8x32xf32>,
    } else {
    }
    return
  }
  func.func @transform_0(%arg0: i32, %arg1: i32, %arg2: i32) -> (i32, i32, i32) {
    %c0_i32 = arith.constant 0 : i32
    %c0_i32_0 = arith.constant 0 : i32
    return %arg0, %arg1, %c0_i32 : i32, i32, i32
  }
  func.func @transform_1(%arg0: i32, %arg1: i32, %arg2: i32) -> (i32, i32, i32) {
    %c0_i32 = arith.constant 0 : i32
    %c0_i32_0 = arith.constant 0 : i32
    return %arg0, %arg2, %c0_i32 : i32, i32, i32
  }
  func.func @transform_2(%arg0: i32, %arg1: i32, %arg2: i32) -> (i32, i32) {
    %c0_i32 = arith.constant 0 : i32
    %c0_i32_0 = arith.constant 0 : i32
    %c0_i32_1 = arith.constant 0 : i32
    return %c0_i32, %c0_i32_0 : i32, i32
  }
  func.func @transform_3(%arg0: i32, %arg1: i32, %arg2: i32) -> (i32, i32) {
    %c0_i32 = arith.constant 0 : i32
    %c0_i32_0 = arith.constant 0 : i32
    %c0_i32_1 = arith.constant 0 : i32
    return %c0_i32, %c0_i32_0 : i32, i32
  }
  func.func @transform_4(%arg0: i32, %arg1: i32, %arg2: i32) -> (i32, i32) {
    %c0_i32 = arith.constant 0 : i32
    %c0_i32_0 = arith.constant 0 : i32
    %c0_i32_1 = arith.constant 0 : i32
    return %c0_i32, %c0_i32_0 : i32, i32
  }
  func.func @transform_5(%arg0: i32, %arg1: i32, %arg2: i32) -> (i32, i32) {
    %c0_i32 = arith.constant 0 : i32
    %c0_i32_0 = arith.constant 0 : i32
    %c0_i32_1 = arith.constant 0 : i32
    return %c0_i32, %c0_i32_0 : i32, i32
  }
  func.func @transform_6(%arg0: i32, %arg1: i32, %arg2: i32) -> (i32, i32, i32) {
    %c0_i32 = arith.constant 0 : i32
    %c0_i32_0 = arith.constant 0 : i32
    return %arg0, %arg1, %c0_i32 : i32, i32, i32
  }
}

module attributes {stable_mosaic.version = 11 : i64} {
  func.func @mha_kernel(%arg0: i32, %arg1: i32, %arg2: i32, %arg3: memref<1x8x32xf32, #tpu.memory_space<vmem>>, %arg4: memref<1x8x32xf32, #tpu.memory_space<vmem>>, %arg5: memref<32x96xf32, #tpu.memory_space<vmem>>, %arg6: memref<1x96xf32, #tpu.memory_space<vmem>>, %arg7: memref<32x32xf32, #tpu.memory_space<vmem>>, %arg8: memref<1x32xf32, #tpu.memory_space<vmem>>, %arg9: memref<1x8x32xf32, #tpu.memory_space<vmem>>, %arg10: memref<4x8x8xf32, #tpu.memory_space<vmem>>, %arg11: memref<4x8x8xf32, #tpu.memory_space<vmem>>, %arg12: memref<8x32xf32, #tpu.memory_space<vmem>>) attributes {dimension_semantics = [#tpu.dimension_semantics<parallel>, #tpu.dimension_semantics<parallel>, #tpu.dimension_semantics<arbitrary>], iteration_bounds = array<i64: 2, 1, 1>, scalar_prefetch = 0 : i64, scratch_operands = 3 : i64, tpu.core_type = #tpu.core_type<tc>, window_params = [{transform_indices = @transform_0, window_bounds = array<i64: 1, 8, 32>}, {transform_indices = @transform_1, window_bounds = array<i64: 1, 8, 32>}, {pipeline_mode = #tpu.pipeline_mode<synchronous>, transform_indices = @transform_2, window_bounds = array<i64: 32, 96>}, {pipeline_mode = #tpu.pipeline_mode<synchronous>, transform_indices = @transform_3, window_bounds = array<i64: 1, 96>}, {pipeline_mode = #tpu.pipeline_mode<synchronous>, transform_indices = @transform_4, window_bounds = array<i64: 32, 32>}, {pipeline_mode = #tpu.pipeline_mode<synchronous>, transform_indices = @transform_5, window_bounds = array<i64: 1, 32>}, {transform_indices = @transform_6, window_bounds = array<i64: 1, 8, 32>}]} {
    %c0_i32 = arith.constant 0 : i32
    %0 = arith.cmpi eq, %arg2, %c0_i32 : i32
    %1 = arith.extui %0 : i1 to i32
    %c0_i32_0 = arith.constant 0 : i32
    %2 = arith.cmpi ne, %1, %c0_i32_0 : i32
    scf.if %2 {
      %c0_55 = arith.constant 0 : index
      %c0_56 = arith.constant 0 : index
      %c0_57 = arith.constant 0 : index
      %80 = vector.load %arg3[%c0_55, %c0_56, %c0_57] : memref<1x8x32xf32, #tpu.memory_space<vmem>>, vector<1x8x32xf32>
      %81 = vector.shape_cast %80 : vector<1x8x32xf32> to vector<8x32xf32>
      %c0_58 = arith.constant 0 : index
      %c0_59 = arith.constant 0 : index
      %82 = vector.load %arg5[%c0_58, %c0_59] : memref<32x96xf32, #tpu.memory_space<vmem>>, vector<32x32xf32>
      %cst_60 = arith.constant dense<0.000000e+00> : vector<8x32xf32>
      %83 = tpu.matmul %81, %82, %cst_60 {dimension_numbers = #tpu.dot_dimension_numbers<[1], [0], [0], [1], [0, 0, 1, 1], [], []>} : vector<8x32xf32>, vector<32x32xf32>, vector<8x32xf32> -> vector<8x32xf32>
      %c0_61 = arith.constant 0 : index
      %c0_62 = arith.constant 0 : index
      %84 = vector.load %arg6[%c0_61, %c0_62] : memref<1x96xf32, #tpu.memory_space<vmem>>, vector<1x32xf32>
      %85 = vector.broadcast %84 : vector<1x32xf32> to vector<8x32xf32>
      %86 = arith.addf %83, %85 : vector<8x32xf32>
      %cst_63 = arith.constant 0.353553385 : f32
      %87 = vector.broadcast %cst_63 : f32 to vector<8x32xf32>
      %88 = arith.mulf %86, %87 : vector<8x32xf32>
      %89 = vector.extract_strided_slice %88 {offsets = [0, 0], sizes = [8, 8], strides = [1, 1]} : vector<8x32xf32> to vector<8x8xf32>
      %c0_64 = arith.constant 0 : index
      %c0_65 = arith.constant 0 : index
      %c0_66 = arith.constant 0 : index
      %90 = vector.load %arg10[%c0_64, %c0_65, %c0_66] : memref<4x8x8xf32, #tpu.memory_space<vmem>>, vector<1x8x8xf32>
      %91 = vector.shape_cast %90 : vector<1x8x8xf32> to vector<8x8xf32>
      %92 = vector.shape_cast %89 : vector<8x8xf32> to vector<1x8x8xf32>
      tpu.vector_store %arg10[%c0_64, %c0_65, %c0_66], %92 {strides = array<i32>} : memref<4x8x8xf32, #tpu.memory_space<vmem>>, vector<1x8x8xf32>,
      %93 = vector.extract_strided_slice %88 {offsets = [0, 8], sizes = [8, 8], strides = [1, 1]} : vector<8x32xf32> to vector<8x8xf32>
      %c1_67 = arith.constant 1 : index
      %c0_68 = arith.constant 0 : index
      %c0_69 = arith.constant 0 : index
      %94 = vector.load %arg10[%c1_67, %c0_68, %c0_69] : memref<4x8x8xf32, #tpu.memory_space<vmem>>, vector<1x8x8xf32>
      %95 = vector.shape_cast %94 : vector<1x8x8xf32> to vector<8x8xf32>
      %96 = vector.shape_cast %93 : vector<8x8xf32> to vector<1x8x8xf32>
      tpu.vector_store %arg10[%c1_67, %c0_68, %c0_69], %96 {strides = array<i32>} : memref<4x8x8xf32, #tpu.memory_space<vmem>>, vector<1x8x8xf32>,
      %97 = vector.extract_strided_slice %88 {offsets = [0, 16], sizes = [8, 8], strides = [1, 1]} : vector<8x32xf32> to vector<8x8xf32>
      %c2_70 = arith.constant 2 : index
      %c0_71 = arith.constant 0 : index
      %c0_72 = arith.constant 0 : index
      %98 = vector.load %arg10[%c2_70, %c0_71, %c0_72] : memref<4x8x8xf32, #tpu.memory_space<vmem>>, vector<1x8x8xf32>
      %99 = vector.shape_cast %98 : vector<1x8x8xf32> to vector<8x8xf32>
      %100 = vector.shape_cast %97 : vector<8x8xf32> to vector<1x8x8xf32>
      tpu.vector_store %arg10[%c2_70, %c0_71, %c0_72], %100 {strides = array<i32>} : memref<4x8x8xf32, #tpu.memory_space<vmem>>, vector<1x8x8xf32>,
      %101 = vector.extract_strided_slice %88 {offsets = [0, 24], sizes = [8, 8], strides = [1, 1]} : vector<8x32xf32> to vector<8x8xf32>
      %c3_73 = arith.constant 3 : index
      %c0_74 = arith.constant 0 : index
      %c0_75 = arith.constant 0 : index
      %102 = vector.load %arg10[%c3_73, %c0_74, %c0_75] : memref<4x8x8xf32, #tpu.memory_space<vmem>>, vector<1x8x8xf32>
      %103 = vector.shape_cast %102 : vector<1x8x8xf32> to vector<8x8xf32>
      %104 = vector.shape_cast %101 : vector<8x8xf32> to vector<1x8x8xf32>
      tpu.vector_store %arg10[%c3_73, %c0_74, %c0_75], %104 {strides = array<i32>} : memref<4x8x8xf32, #tpu.memory_space<vmem>>, vector<1x8x8xf32>,
      %cst_76 = arith.constant 0.000000e+00 : f32
      %105 = vector.broadcast %cst_76 : f32 to vector<8x32xf32>
      %c0_77 = arith.constant 0 : index
      %c0_78 = arith.constant 0 : index
      %106 = vector.load %arg12[%c0_77, %c0_78] : memref<8x32xf32, #tpu.memory_space<vmem>>, vector<8x32xf32>
      tpu.vector_store %arg12[%c0_77, %c0_78], %105 {strides = array<i32>} : memref<8x32xf32, #tpu.memory_space<vmem>>, vector<8x32xf32>,
    } else {
    }
    %c0 = arith.constant 0 : index
    %c0_1 = arith.constant 0 : index
    %c0_2 = arith.constant 0 : index
    %3 = vector.load %arg4[%c0, %c0_1, %c0_2] : memref<1x8x32xf32, #tpu.memory_space<vmem>>, vector<1x8x32xf32>
    %4 = vector.shape_cast %3 : vector<1x8x32xf32> to vector<8x32xf32>
    %c0_3 = arith.constant 0 : index
    %c32 = arith.constant 32 : index
    %5 = vector.load %arg5[%c0_3, %c32] : memref<32x96xf32, #tpu.memory_space<vmem>>, vector<32x64xf32>
    %cst = arith.constant dense<0.000000e+00> : vector<8x64xf32>
    %6 = tpu.matmul %4, %5, %cst {dimension_numbers = #tpu.dot_dimension_numbers<[1], [0], [0], [1], [0, 0, 1, 1], [], []>} : vector<8x32xf32>, vector<32x64xf32>, vector<8x64xf32> -> vector<8x64xf32>
    %c0_4 = arith.constant 0 : index
    %c32_5 = arith.constant 32 : index
    %7 = vector.load %arg6[%c0_4, %c32_5] : memref<1x96xf32, #tpu.memory_space<vmem>>, vector<1x64xf32>
    %8 = vector.broadcast %7 : vector<1x64xf32> to vector<8x64xf32>
    %9 = arith.addf %6, %8 : vector<8x64xf32>
    %10 = vector.extract_strided_slice %9 {offsets = [0, 0], sizes = [8, 8], strides = [1, 1]} : vector<8x64xf32> to vector<8x8xf32>
    %c0_6 = arith.constant 0 : index
    %c0_7 = arith.constant 0 : index
    %c0_8 = arith.constant 0 : index
    %11 = vector.load %arg10[%c0_6, %c0_7, %c0_8] : memref<4x8x8xf32, #tpu.memory_space<vmem>>, vector<1x8x8xf32>
    %12 = vector.shape_cast %11 : vector<1x8x8xf32> to vector<8x8xf32>
    %cst_9 = arith.constant dense<0.000000e+00> : vector<8x8xf32>
    %13 = tpu.matmul %12, %10, %cst_9 {dimension_numbers = #tpu.dot_dimension_numbers<[1], [1], [0], [0], [0, 0, 1, 0], [], []>} : vector<8x8xf32>, vector<8x8xf32>, vector<8x8xf32> -> vector<8x8xf32>
    %c0_10 = arith.constant 0 : index
    %c0_11 = arith.constant 0 : index
    %c0_12 = arith.constant 0 : index
    %14 = vector.load %arg11[%c0_10, %c0_11, %c0_12] : memref<4x8x8xf32, #tpu.memory_space<vmem>>, vector<1x8x8xf32>
    %15 = vector.shape_cast %14 : vector<1x8x8xf32> to vector<8x8xf32>
    %16 = vector.shape_cast %13 : vector<8x8xf32> to vector<1x8x8xf32>
    tpu.vector_store %arg11[%c0_10, %c0_11, %c0_12], %16 {strides = array<i32>} : memref<4x8x8xf32, #tpu.memory_space<vmem>>, vector<1x8x8xf32>,
    %17 = vector.extract_strided_slice %9 {offsets = [0, 8], sizes = [8, 8], strides = [1, 1]} : vector<8x64xf32> to vector<8x8xf32>
    %c1 = arith.constant 1 : index
    %c0_13 = arith.constant 0 : index
    %c0_14 = arith.constant 0 : index
    %18 = vector.load %arg10[%c1, %c0_13, %c0_14] : memref<4x8x8xf32, #tpu.memory_space<vmem>>, vector<1x8x8xf32>
    %19 = vector.shape_cast %18 : vector<1x8x8xf32> to vector<8x8xf32>
    %cst_15 = arith.constant dense<0.000000e+00> : vector<8x8xf32>
    %20 = tpu.matmul %19, %17, %cst_15 {dimension_numbers = #tpu.dot_dimension_numbers<[1], [1], [0], [0], [0, 0, 1, 0], [], []>} : vector<8x8xf32>, vector<8x8xf32>, vector<8x8xf32> -> vector<8x8xf32>
    %c1_16 = arith.constant 1 : index
    %c0_17 = arith.constant 0 : index
    %c0_18 = arith.constant 0 : index
    %21 = vector.load %arg11[%c1_16, %c0_17, %c0_18] : memref<4x8x8xf32, #tpu.memory_space<vmem>>, vector<1x8x8xf32>
    %22 = vector.shape_cast %21 : vector<1x8x8xf32> to vector<8x8xf32>
    %23 = vector.shape_cast %20 : vector<8x8xf32> to vector<1x8x8xf32>
    tpu.vector_store %arg11[%c1_16, %c0_17, %c0_18], %23 {strides = array<i32>} : memref<4x8x8xf32, #tpu.memory_space<vmem>>, vector<1x8x8xf32>,
    %24 = vector.extract_strided_slice %9 {offsets = [0, 16], sizes = [8, 8], strides = [1, 1]} : vector<8x64xf32> to vector<8x8xf32>
    %c2 = arith.constant 2 : index
    %c0_19 = arith.constant 0 : index
    %c0_20 = arith.constant 0 : index
    %25 = vector.load %arg10[%c2, %c0_19, %c0_20] : memref<4x8x8xf32, #tpu.memory_space<vmem>>, vector<1x8x8xf32>
    %26 = vector.shape_cast %25 : vector<1x8x8xf32> to vector<8x8xf32>
    %cst_21 = arith.constant dense<0.000000e+00> : vector<8x8xf32>
    %27 = tpu.matmul %26, %24, %cst_21 {dimension_numbers = #tpu.dot_dimension_numbers<[1], [1], [0], [0], [0, 0, 1, 0], [], []>} : vector<8x8xf32>, vector<8x8xf32>, vector<8x8xf32> -> vector<8x8xf32>
    %c2_22 = arith.constant 2 : index
    %c0_23 = arith.constant 0 : index
    %c0_24 = arith.constant 0 : index
    %28 = vector.load %arg11[%c2_22, %c0_23, %c0_24] : memref<4x8x8xf32, #tpu.memory_space<vmem>>, vector<1x8x8xf32>
    %29 = vector.shape_cast %28 : vector<1x8x8xf32> to vector<8x8xf32>
    %30 = vector.shape_cast %27 : vector<8x8xf32> to vector<1x8x8xf32>
    tpu.vector_store %arg11[%c2_22, %c0_23, %c0_24], %30 {strides = array<i32>} : memref<4x8x8xf32, #tpu.memory_space<vmem>>, vector<1x8x8xf32>,
    %31 = vector.extract_strided_slice %9 {offsets = [0, 24], sizes = [8, 8], strides = [1, 1]} : vector<8x64xf32> to vector<8x8xf32>
    %c3 = arith.constant 3 : index
    %c0_25 = arith.constant 0 : index
    %c0_26 = arith.constant 0 : index
    %32 = vector.load %arg10[%c3, %c0_25, %c0_26] : memref<4x8x8xf32, #tpu.memory_space<vmem>>, vector<1x8x8xf32>
    %33 = vector.shape_cast %32 : vector<1x8x8xf32> to vector<8x8xf32>
    %cst_27 = arith.constant dense<0.000000e+00> : vector<8x8xf32>
    %34 = tpu.matmul %33, %31, %cst_27 {dimension_numbers = #tpu.dot_dimension_numbers<[1], [1], [0], [0], [0, 0, 1, 0], [], []>} : vector<8x8xf32>, vector<8x8xf32>, vector<8x8xf32> -> vector<8x8xf32>
    %c3_28 = arith.constant 3 : index
    %c0_29 = arith.constant 0 : index
    %c0_30 = arith.constant 0 : index
    %35 = vector.load %arg11[%c3_28, %c0_29, %c0_30] : memref<4x8x8xf32, #tpu.memory_space<vmem>>, vector<1x8x8xf32>
    %36 = vector.shape_cast %35 : vector<1x8x8xf32> to vector<8x8xf32>
    %37 = vector.shape_cast %34 : vector<8x8xf32> to vector<1x8x8xf32>
    tpu.vector_store %arg11[%c3_28, %c0_29, %c0_30], %37 {strides = array<i32>} : memref<4x8x8xf32, #tpu.memory_space<vmem>>, vector<1x8x8xf32>,
    %c0_31 = arith.constant 0 : index
    %c0_32 = arith.constant 0 : index
    %c0_33 = arith.constant 0 : index
    %38 = vector.load %arg11[%c0_31, %c0_32, %c0_33] : memref<4x8x8xf32, #tpu.memory_space<vmem>>, vector<4x8x8xf32>
    %cst_34 = arith.constant dense<0xFF800000> : vector<8x8xf32>
    %39 = vector.multi_reduction <maximumf>, %38, %cst_34 [0] : vector<4x8x8xf32> to vector<8x8xf32>
    %40 = vector.shape_cast %39 : vector<8x8xf32> to vector<1x8x8xf32>
    %41 = vector.broadcast %40 : vector<1x8x8xf32> to vector<4x8x8xf32>
    %42 = arith.subf %38, %41 : vector<4x8x8xf32>
    %43 = math.exp %42 : vector<4x8x8xf32>
    %cst_35 = arith.constant dense<0.000000e+00> : vector<8x8xf32>
    %44 = vector.multi_reduction <add>, %43, %cst_35 [0] : vector<4x8x8xf32> to vector<8x8xf32>
    %45 = vector.shape_cast %44 : vector<8x8xf32> to vector<1x8x8xf32>
    %46 = tpu.reciprocal %45 : vector<1x8x8xf32> -> vector<1x8x8xf32>
    %47 = vector.broadcast %46 : vector<1x8x8xf32> to vector<4x8x8xf32>
    %48 = arith.mulf %43, %47 : vector<4x8x8xf32>
    %49 = vector.extract_strided_slice %9 {offsets = [0, 32], sizes = [8, 8], strides = [1, 1]} : vector<8x64xf32> to vector<8x8xf32>
    %50 = vector.extract_strided_slice %48 {offsets = [0, 0, 0], sizes = [1, 8, 8], strides = [1, 1, 1]} : vector<4x8x8xf32> to vector<1x8x8xf32>
    %51 = vector.shape_cast %50 : vector<1x8x8xf32> to vector<8x8xf32>
    %cst_36 = arith.constant dense<0.000000e+00> : vector<8x8xf32>
    %52 = tpu.matmul %51, %49, %cst_36 {dimension_numbers = #tpu.dot_dimension_numbers<[1], [0], [0], [1], [0, 0, 1, 1], [], []>} : vector<8x8xf32>, vector<8x8xf32>, vector<8x8xf32> -> vector<8x8xf32>
    %c0_37 = arith.constant 0 : index
    %c0_38 = arith.constant 0 : index
    %53 = vector.load %arg12[%c0_37, %c0_38] : memref<8x32xf32, #tpu.memory_space<vmem>>, vector<8x8xf32>
    %54 = arith.addf %53, %52 : vector<8x8xf32>
    %c0_39 = arith.constant 0 : index
    %c0_40 = arith.constant 0 : index
    %55 = vector.load %arg12[%c0_39, %c0_40] : memref<8x32xf32, #tpu.memory_space<vmem>>, vector<8x8xf32>
    tpu.vector_store %arg12[%c0_39, %c0_40], %54 {strides = array<i32>} : memref<8x32xf32, #tpu.memory_space<vmem>>, vector<8x8xf32>,
    %56 = vector.extract_strided_slice %9 {offsets = [0, 40], sizes = [8, 8], strides = [1, 1]} : vector<8x64xf32> to vector<8x8xf32>
    %57 = vector.extract_strided_slice %48 {offsets = [1, 0, 0], sizes = [1, 8, 8], strides = [1, 1, 1]} : vector<4x8x8xf32> to vector<1x8x8xf32>
    %58 = vector.shape_cast %57 : vector<1x8x8xf32> to vector<8x8xf32>
    %cst_41 = arith.constant dense<0.000000e+00> : vector<8x8xf32>
    %59 = tpu.matmul %58, %56, %cst_41 {dimension_numbers = #tpu.dot_dimension_numbers<[1], [0], [0], [1], [0, 0, 1, 1], [], []>} : vector<8x8xf32>, vector<8x8xf32>, vector<8x8xf32> -> vector<8x8xf32>
    %c0_42 = arith.constant 0 : index
    %c8 = arith.constant 8 : index
    %60 = vector.load %arg12[%c0_42, %c8] : memref<8x32xf32, #tpu.memory_space<vmem>>, vector<8x8xf32>
    %61 = arith.addf %60, %59 : vector<8x8xf32>
    %c0_43 = arith.constant 0 : index
    %c8_44 = arith.constant 8 : index
    %62 = vector.load %arg12[%c0_43, %c8_44] : memref<8x32xf32, #tpu.memory_space<vmem>>, vector<8x8xf32>
    tpu.vector_store %arg12[%c0_43, %c8_44], %61 {strides = array<i32>} : memref<8x32xf32, #tpu.memory_space<vmem>>, vector<8x8xf32>,
    %63 = vector.extract_strided_slice %9 {offsets = [0, 48], sizes = [8, 8], strides = [1, 1]} : vector<8x64xf32> to vector<8x8xf32>
    %64 = vector.extract_strided_slice %48 {offsets = [2, 0, 0], sizes = [1, 8, 8], strides = [1, 1, 1]} : vector<4x8x8xf32> to vector<1x8x8xf32>
    %65 = vector.shape_cast %64 : vector<1x8x8xf32> to vector<8x8xf32>
    %cst_45 = arith.constant dense<0.000000e+00> : vector<8x8xf32>
    %66 = tpu.matmul %65, %63, %cst_45 {dimension_numbers = #tpu.dot_dimension_numbers<[1], [0], [0], [1], [0, 0, 1, 1], [], []>} : vector<8x8xf32>, vector<8x8xf32>, vector<8x8xf32> -> vector<8x8xf32>
    %c0_46 = arith.constant 0 : index
    %c16 = arith.constant 16 : index
    %67 = vector.load %arg12[%c0_46, %c16] : memref<8x32xf32, #tpu.memory_space<vmem>>, vector<8x8xf32>
    %68 = arith.addf %67, %66 : vector<8x8xf32>
    %c0_47 = arith.constant 0 : index
    %c16_48 = arith.constant 16 : index
    %69 = vector.load %arg12[%c0_47, %c16_48] : memref<8x32xf32, #tpu.memory_space<vmem>>, vector<8x8xf32>
    tpu.vector_store %arg12[%c0_47, %c16_48], %68 {strides = array<i32>} : memref<8x32xf32, #tpu.memory_space<vmem>>, vector<8x8xf32>,
    %70 = vector.extract_strided_slice %9 {offsets = [0, 56], sizes = [8, 8], strides = [1, 1]} : vector<8x64xf32> to vector<8x8xf32>
    %71 = vector.extract_strided_slice %48 {offsets = [3, 0, 0], sizes = [1, 8, 8], strides = [1, 1, 1]} : vector<4x8x8xf32> to vector<1x8x8xf32>
    %72 = vector.shape_cast %71 : vector<1x8x8xf32> to vector<8x8xf32>
    %cst_49 = arith.constant dense<0.000000e+00> : vector<8x8xf32>
    %73 = tpu.matmul %72, %70, %cst_49 {dimension_numbers = #tpu.dot_dimension_numbers<[1], [0], [0], [1], [0, 0, 1, 1], [], []>} : vector<8x8xf32>, vector<8x8xf32>, vector<8x8xf32> -> vector<8x8xf32>
    %c0_50 = arith.constant 0 : index
    %c24 = arith.constant 24 : index
    %74 = vector.load %arg12[%c0_50, %c24] : memref<8x32xf32, #tpu.memory_space<vmem>>, vector<8x8xf32>
    %75 = arith.addf %74, %73 : vector<8x8xf32>
    %c0_51 = arith.constant 0 : index
    %c24_52 = arith.constant 24 : index
    %76 = vector.load %arg12[%c0_51, %c24_52] : memref<8x32xf32, #tpu.memory_space<vmem>>, vector<8x8xf32>
    tpu.vector_store %arg12[%c0_51, %c24_52], %75 {strides = array<i32>} : memref<8x32xf32, #tpu.memory_space<vmem>>, vector<8x8xf32>,
    %c0_i32_53 = arith.constant 0 : i32
    %77 = arith.cmpi eq, %arg2, %c0_i32_53 : i32
    %78 = arith.extui %77 : i1 to i32
    %c0_i32_54 = arith.constant 0 : i32
    %79 = arith.cmpi ne, %78, %c0_i32_54 : i32
    scf.if %79 {
      %c0_55 = arith.constant 0 : index
      %c0_56 = arith.constant 0 : index
      %80 = vector.load %arg12[%c0_55, %c0_56] : memref<8x32xf32, #tpu.memory_space<vmem>>, vector<8x32xf32>
      %c0_57 = arith.constant 0 : index
      %c0_58 = arith.constant 0 : index
      %81 = vector.load %arg7[%c0_57, %c0_58] : memref<32x32xf32, #tpu.memory_space<vmem>>, vector<32x32xf32>
      %cst_59 = arith.constant dense<0.000000e+00> : vector<8x32xf32>
      %82 = tpu.matmul %80, %81, %cst_59 {dimension_numbers = #tpu.dot_dimension_numbers<[1], [0], [0], [1], [0, 0, 1, 1], [], []>} : vector<8x32xf32>, vector<32x32xf32>, vector<8x32xf32> -> vector<8x32xf32>
      %c0_60 = arith.constant 0 : index
      %c0_61 = arith.constant 0 : index
      %83 = vector.load %arg8[%c0_60, %c0_61] : memref<1x32xf32, #tpu.memory_space<vmem>>, vector<1x32xf32>
      %84 = vector.broadcast %83 : vector<1x32xf32> to vector<8x32xf32>
      %85 = arith.addf %82, %84 : vector<8x32xf32>
      %c0_62 = arith.constant 0 : index
      %c0_63 = arith.constant 0 : index
      %c0_64 = arith.constant 0 : index
      %86 = vector.load %arg9[%c0_62, %c0_63, %c0_64] : memref<1x8x32xf32, #tpu.memory_space<vmem>>, vector<1x8x32xf32>
      %87 = vector.shape_cast %86 : vector<1x8x32xf32> to vector<8x32xf32>
      %88 = vector.shape_cast %85 : vector<8x32xf32> to vector<1x8x32xf32>
      tpu.vector_store %arg9[%c0_62, %c0_63, %c0_64], %88 {strides = array<i32>} : memref<1x8x32xf32, #tpu.memory_space<vmem>>, vector<1x8x32xf32>,
    } else {
    }
    return
  }
  func.func @transform_0(%arg0: i32, %arg1: i32, %arg2: i32) -> (i32, i32, i32) {
    %c0_i32 = arith.constant 0 : i32
    %c0_i32_0 = arith.constant 0 : i32
    return %arg0, %arg1, %c0_i32 : i32, i32, i32
  }
  func.func @transform_1(%arg0: i32, %arg1: i32, %arg2: i32) -> (i32, i32, i32) {
    %c0_i32 = arith.constant 0 : i32
    %c0_i32_0 = arith.constant 0 : i32
    return %arg0, %arg2, %c0_i32 : i32, i32, i32
  }
  func.func @transform_2(%arg0: i32, %arg1: i32, %arg2: i32) -> (i32, i32) {
    %c0_i32 = arith.constant 0 : i32
    %c0_i32_0 = arith.constant 0 : i32
    %c0_i32_1 = arith.constant 0 : i32
    return %c0_i32, %c0_i32_0 : i32, i32
  }
  func.func @transform_3(%arg0: i32, %arg1: i32, %arg2: i32) -> (i32, i32) {
    %c0_i32 = arith.constant 0 : i32
    %c0_i32_0 = arith.constant 0 : i32
    %c0_i32_1 = arith.constant 0 : i32
    return %c0_i32, %c0_i32_0 : i32, i32
  }
  func.func @transform_4(%arg0: i32, %arg1: i32, %arg2: i32) -> (i32, i32) {
    %c0_i32 = arith.constant 0 : i32
    %c0_i32_0 = arith.constant 0 : i32
    %c0_i32_1 = arith.constant 0 : i32
    return %c0_i32, %c0_i32_0 : i32, i32
  }
  func.func @transform_5(%arg0: i32, %arg1: i32, %arg2: i32) -> (i32, i32) {
    %c0_i32 = arith.constant 0 : i32
    %c0_i32_0 = arith.constant 0 : i32
    %c0_i32_1 = arith.constant 0 : i32
    return %c0_i32, %c0_i32_0 : i32, i32
  }
  func.func @transform_6(%arg0: i32, %arg1: i32, %arg2: i32) -> (i32, i32, i32) {
    %c0_i32 = arith.constant 0 : i32
    %c0_i32_0 = arith.constant 0 : i32
    return %arg0, %arg1, %c0_i32 : i32, i32, i32
  }
}

</mosaic_0001>

<bundles_post_ra>
// kernel: tpu_custom_call.1
= control target key start
LH: loop header
LB: loop body
LE: loop exit
PB: predicated region body
PF: predicated region fallthrough
CT: control target
= control target key end

     0   :  { %s2592_s0 = inlined_call_operand.hbm [shape: f32[2,8,32], index: 0, kind: input, shape index: {}]   ;;  %s2593_s1 = inlined_call_operand.hbm [shape: f32[2,8,32], index: 1, kind: input, shape index: {}]   ;;  %s2594_s2 = inlined_call_operand.hbm [shape: f32[32,96], index: 2, kind: input, shape index: {}]   ;;  %s2595_s3 = inlined_call_operand.hbm [shape: f32[1,96], index: 3, kind: input, shape index: {}]   ;;  %s2596_s4 = inlined_call_operand.hbm [shape: f32[32,32], index: 4, kind: input, shape index: {}]   ;;  %s2597_s5 = inlined_call_operand.hbm [shape: f32[1,32], index: 5, kind: input, shape index: {}]   ;;  %s2598_s6 = inlined_call_operand.hbm [shape: f32[2,8,32], index: 6, kind: output, shape index: {}]  }
   0x1   :  { %2604 = sst [smem:[#allocation24_spill]] %s2594_s2 }
   0x2   :  { %2605 = sst [smem:[#allocation25_spill]] %s2595_s3 }
   0x3   :  { %2606 = sst [smem:[#allocation26_spill]] %s2596_s4 }
   0x4   :  { %2607 = sst [smem:[#allocation27_spill]] %s2597_s5 }
   0x5   :  { %11 = vsyncpa [#allocation6], 0 }
   0x6   :  { %13 = vsyncpa [#allocation6 + $0x1], 0 }
   0x7   :  { %14 = vsyncpa [#allocation9], 0 }
   0x8   :  { %16 = vsyncpa [#allocation9 + $0x1], 0 }
   0x9   :  { %17 = vsyncpa [#allocation12], 0 }
   0xa   :  { %18 = vsyncpa [#allocation15], 0 }
   0xb   :  { %19 = vsyncpa [#allocation7], 0 }
   0xc   :  { %21 = vsyncpa [#allocation7 + $0x1], 0  ;;  %s2172_s21 = smov 0   ;;  %s2174_s22 = smov 0  }
   0xd   :  { %s2176_s23 = smov 0   ;;  %s2178_s24 = smov 0  }
   0xe   :  { %s2180_s25 = smov 0   ;;  %s2182_s26 = smov 0  }
   0xf LB: > { %s2203_s27 = sadd.s32 4294967295, %s2113_s26   ;;  %p1538_p0 = scmp.ge.s32.totalorder %s2113_s26, 1  ;;  %s2113_s26 = sphi %s2182_s26, %s27_s26   ;;  %s2109_s25 = sphi %s2180_s25, %s2638_s25   ;;  %s2105_s24 = sphi %s2178_s24, %s2637_s24   ;;  %s2101_s23 = sphi %s2176_s23, %s2636_s23   ;;  %s2097_s22 = sphi %s2174_s22, %s2635_s22   ;;  %s2093_s21 = sphi %s2172_s21, %s2634_s21  }
  0x10   : > { %p2599_p1 = scmp.eq.s32.totalorder %s2203_s27, 0  ;;  %p219_p2 = scmp.lt.s32.totalorder %s2113_s26, 3 }
  0x11   : > { %s2115_s29 = smov [#allocation10]   ;;  %s2116_s8 = smov [#allocation11]  }
  0x12   : > { %p2208_p3 = pnand %p1538_p0, %p219_p2  ;;  %s231_s30 = sshll.u32 %s2115_s29, 4  ;;  %s2212_s30 = int_to_ptr.vmem [resolvable:$true] %s231_s30 }
  0x13   : > { %s245_s9 = sshll.u32 %s2116_s8, 4  ;;  %s2117_s10 = smov [#allocation13]   ;;  %s2223_s9 = int_to_ptr.vmem [resolvable:$true] %s245_s9 }
  0x14   : > { %s2608_s28 = scalar_select %p2208_p3, 1, 0 }
  0x15   : > { %p1722_p4 = pneg %p2208_p3  ;;  %s2225_s11 = sshll.u32 %s2117_s10, 4  ;;  %s256_s11 = int_to_ptr.vmem [resolvable:$true] %s2225_s11 }
  0x16   : > { %s2610_s2 = sld [smem:[#allocation24_spill]] }
  0x17   : > { %p2219_p6 = pnand %p1722_p4, %p2599_p1 }
  0x19   : > { %p2235_p8 = pneg %p2219_p6 }
  0x1c   : > { %s1843_s14 = scalar_lea.hbm %s2610_s2, 512 }
  0x1d   : > { %p1844_p7 = scmp.ne.s32.totalorder %s2610_s2, %s1843_s14  ;;  %p1850_p11 = scmp.lt.u32.totalorder %s1843_s14, %s2610_s2 }
  0x1f   : > { %p1846_p9 = pnand %p2235_p8, %p1844_p7 }
  0x21   : > { %p1847_p10 = pneg %p1846_p9 }
  0x23   : > { %p1852_p12 = pnand %p1850_p11, %p1847_p10 }
  0x25   : > { %1855 = shalt.err (!%p1852_p12)
}
  0x26   : > { %s1856_s20 = scalar_lea.vmem %s2212_s30, 512  ;;  %p1864_p4 = scmp.lt.s32.totalorder %s2212_s30, %s2212_s30 }
  0x27   : > { %p1857_p13 = scmp.ne.s32.totalorder %s2212_s30, %s1856_s20  ;;  %p1865_p5 = scmp.lt.s32.totalorder %s1856_s20, %s1856_s20 }
  0x29   : > { %p1859_p0 = pnand %p1857_p13, %p2235_p8  ;;  %p1866_p7 = por %p1865_p5, %p1864_p4 }
  0x2b   : > { %p1860_p2 = pneg %p1859_p0 }
  0x2d   : > { %p1867_p9 = pnand %p1866_p7, %p1860_p2 }
  0x2f   : > { %1870 = shalt.err (!%p1867_p9)
}
  0x30   : > { %s2118_s29 = smov 128   ;;  %s2119_s8 = smov 8  }
  0x31   : > { %1725 = dma.hbm_to_vmem [thread:$0]  (!%p2219_p6), %s2610_s2, 512, %s2212_s30, [#allocation9], %s2118_s29, %s2118_s29, %s2119_s8  }
  0x32   : > { %s2612_s3 = sld [smem:[#allocation25_spill]] }
  0x38   : > { %s1871_s15 = scalar_lea.hbm %s2612_s3, 16 }
  0x39   : > { %p1872_p5 = scmp.ne.s32.totalorder %s2612_s3, %s1871_s15  ;;  %p1878_p12 = scmp.lt.u32.totalorder %s1871_s15, %s2612_s3 }
  0x3b   : > { %p1874_p10 = pnand %p1872_p5, %p2235_p8 }
  0x3d   : > { %p1875_p11 = pneg %p1874_p10 }
  0x3f   : > { %p1880_p13 = pnand %p1878_p12, %p1875_p11 }
  0x41   : > { %1883 = shalt.err (!%p1880_p13)
}
  0x42   : > { %s1884_s30 = scalar_lea.vmem %s2223_s9, 16  ;;  %s1891_s10 = scalar_lea.vmem %s2223_s9, 32 }
  0x43   : > { %p1885_p0 = scmp.ne.s32.totalorder %s2223_s9, %s1884_s30  ;;  %p1892_p7 = scmp.lt.s32.totalorder %s2223_s9, %s2223_s9 }
  0x44   : > { %p1893_p9 = scmp.lt.s32.totalorder %s1891_s10, %s1884_s30 }
  0x45   : > { %p1887_p2 = pnand %p1885_p0, %p2235_p8 }
  0x46   : > { %p1894_p5 = por %p1893_p9, %p1892_p7 }
  0x47   : > { %p1888_p4 = pneg %p1887_p2 }
  0x49   : > { %p1895_p10 = pnand %p1894_p5, %p1888_p4 }
  0x4b   : > { %1898 = shalt.err (!%p1895_p10)
}
  0x4c   : > { %1728 = dma.hbm_to_vmem [thread:$0]  (!%p2219_p6), %s2612_s3, 16, %s2223_s9, [#allocation12]  }
  0x4d   : > { %s2613_s4 = sld [smem:[#allocation26_spill]] }
  0x53   : > { %s1899_s16 = scalar_lea.hbm %s2613_s4, 512 }
  0x54   : > { %p1900_p11 = scmp.ne.s32.totalorder %s2613_s4, %s1899_s16  ;;  %p1906_p0 = scmp.lt.u32.totalorder %s1899_s16, %s2613_s4 }
  0x56   : > { %p1902_p12 = pnand %p1900_p11, %p2235_p8 }
  0x58   : > { %p1903_p13 = pneg %p1902_p12 }
  0x5a   : > { %p1908_p2 = pnand %p1906_p0, %p1903_p13 }
  0x5c   : > { %1911 = shalt.err (!%p1908_p2)
}
  0x5d   : > { %s1912_s10 = scalar_lea.vmem %s256_s11, 512  ;;  %p1920_p5 = scmp.lt.s32.totalorder %s256_s11, %s256_s11 }
  0x5e   : > { %p1913_p4 = scmp.ne.s32.totalorder %s256_s11, %s1912_s10  ;;  %p1921_p10 = scmp.lt.s32.totalorder %s1912_s10, %s1912_s10 }
  0x60   : > { %p1915_p7 = pnand %p1913_p4, %p2235_p8  ;;  %p1922_p1 = por %p1921_p10, %p1920_p5 }
  0x62   : > { %p1916_p9 = pneg %p1915_p7 }
  0x64   : > { %p1923_p3 = pnand %p1922_p1, %p1916_p9 }
  0x66   : > { %1926 = shalt.err (!%p1923_p3)
}
  0x67   : > { %1731 = dma.hbm_to_vmem [thread:$0]  (!%p2219_p6), %s2613_s4, 512, %s256_s11, [#allocation12], %s2118_s29, %s2118_s29, %s2119_s8  }
  0x68   : > { %s2120_s13 = smov [#allocation14]   ;;  %s2614_s5 = sld [smem:[#allocation27_spill]] }
  0x69   : > { %s269_s14 = sshll.u32 %s2120_s13, 4  ;;  %s270_s14 = int_to_ptr.vmem [resolvable:$true] %s269_s14 }
  0x6e   : > { %s1927_s18 = scalar_lea.hbm %s2614_s5, 16 }
  0x6f   : > { %p1928_p1 = scmp.ne.s32.totalorder %s2614_s5, %s1927_s18  ;;  %p1934_p12 = scmp.lt.u32.totalorder %s1927_s18, %s2614_s5 }
  0x71   : > { %p1930_p3 = pnand %p1928_p1, %p2235_p8 }
  0x73   : > { %p1931_p11 = pneg %p1930_p3 }
  0x75   : > { %p1936_p13 = pnand %p1934_p12, %p1931_p11 }
  0x77   : > { %1939 = shalt.err (!%p1936_p13)
}
  0x78   : > { %s1940_s11 = scalar_lea.vmem %s270_s14, 16  ;;  %s1947_s29 = scalar_lea.vmem %s270_s14, 32 }
  0x79   : > { %p1941_p0 = scmp.ne.s32.totalorder %s270_s14, %s1940_s11  ;;  %p1948_p7 = scmp.lt.s32.totalorder %s270_s14, %s270_s14 }
  0x7a   : > { %p1949_p9 = scmp.lt.s32.totalorder %s1947_s29, %s1940_s11 }
  0x7b   : > { %p1943_p2 = pnand %p1941_p0, %p2235_p8 }
  0x7c   : > { %p1950_p5 = por %p1949_p9, %p1948_p7 }
  0x7d   : > { %p1944_p4 = pneg %p1943_p2 }
  0x7f   : > { %p1951_p10 = pnand %p1950_p5, %p1944_p4 }
  0x81   : > { %1954 = shalt.err (!%p1951_p10)
}
  0x82   : > { %1734 = dma.hbm_to_vmem [thread:$0]  (!%p2219_p6), %s2614_s5, 16, %s270_s14, [#allocation15]  }
  0x83   : > { %s1537_s17 = sadd.s32 4294967294, %s2113_s26   ;;  %s46_s12 = sadd.s32 1, %s2109_s25 }
  0x84   : > { %p48_p8 = scmp.ge.s32.totalorder %s46_s12, 2  ;;  %s55_s7 = sadd.s32 1, %s2101_s23 }
  0x85   : > { %p62_p1 = scmp.ne.s32.totalorder %s2101_s23, %s2097_s22  ;;  %p63_p3 = scmp.eq.s32.totalorder %s2113_s26, 0 }
  0x86   : > { %s2640_s12 = smov (%p48_p8, %s46_s12), 0  ;;  %p68_p12 = scmp.ne.s32.totalorder %s2097_s22, %s2093_s21 }
  0x87   : > { %2615 = sst [smem:[#allocation23_spill]] %s2640_s12  ;;  %p2331_p11 = por %p63_p3, %p62_p1 }
  0x88   : > { %s50_s14 = ssub.s32 %s2109_s25, %s2640_s12  ;;  %p206_p6 = scmp.eq.s32.totalorder %s2203_s27, 1 }
  0x89   : > { %p53_p13 = scmp.eq.s32.totalorder %s50_s14, 0  ;;  %p2617_p0 = scmp.eq.s32.totalorder %s2203_s27, 0 }
  0x8a   : > { %p2346_p4 = por %p206_p6, %p62_p1  ;;  %p212_p7 = scmp.eq.s32.totalorder %s1537_s17, 1 }
  0x8b   : > { %p2342_p2 = por %p2617_p0, %p68_p12  ;;  %p1750_p5 = scmp.lt.s32.totalorder %s2113_s26, 2 }
  0x8c   : > { %s2619_s16 = scalar_select %p2346_p4, 1, 0 }
  0x8d   : > { %s2618_s15 = scalar_select %p2342_p2, 1, 0 }
  0x8e   : > { %s2351_s18 = scalar_select %p53_p13, %s2101_s23, %s55_s7  }
  0x8f   : > { %p2353_p9 = por %p212_p7, %p68_p12  ;;  %s280_s20 = sand.u32 1, %s2101_s23  }
  0x90   : > { %s1545_s30 = sshll.u32 %s2109_s25, 7  ;;  %s2360_s10 = sshll.u32 %s280_s20, 3 }
  0x91   : > { %s2620_s19 = scalar_select %p2353_p9, 1, 0 }
  0x92   : > { %s2365_s8 = scalar_lea.hbm %s2592_s0, %s1545_s30  ;;  %s284_s9 = scalar_lea.vmem [#allocation5], %s2360_s10 }
  0x93   : > { %s292_s17 = sshll.u32 %s284_s9, 4  ;;  %p2370_p10 = pnand %p1750_p5, %p2331_p11  ;;  %s2374_s17 = int_to_ptr.vmem [resolvable:$true] %s292_s17 }
  0x94   : > { %s2379_s29 = scalar_lea.hbm %s2593_s1, %s1545_s30  ;;  %s281_s2 = scalar_lea.sflag [#allocation6], %s280_s20 }
  0x95   : > { %s1955_s3 = scalar_lea.hbm %s2365_s8, 128  ;;  %p1957_p1 = pneg %p2370_p10 }
  0x96   : > { %p1956_p8 = scmp.ne.s32.totalorder %s2365_s8, %s1955_s3  ;;  %s1960_s4 = scalar_lea.hbm %s2592_s0, 256 }
  0x97   : > { %p1961_p12 = scmp.lt.u32.totalorder %s2365_s8, %s2592_s0  ;;  %p1962_p6 = scmp.lt.u32.totalorder %s1960_s4, %s1955_s3 }
  0x98   : > { %p1958_p3 = pnand %p1957_p1, %p1956_p8  ;;  %p1964_p0 = scmp.lt.u32.totalorder %s1955_s3, %s2365_s8 }
  0x99   : > { %p1963_p13 = por %p1962_p6, %p1961_p12 }
  0x9a   : > { %p1959_p11 = pneg %p1958_p3 }
  0x9b   : > { %p1965_p7 = por %p1964_p0, %p1963_p13 }
  0x9d   : > { %p1966_p5 = pnand %p1965_p7, %p1959_p11 }
  0x9f   : > { %1969 = shalt.err (!%p1966_p5)
}
  0xa0   : > { %s1970_s20 = scalar_lea.vmem %s2374_s17, 128  ;;  %s2121_s30 = smov [#allocation5]  }
  0xa1   : > { %p1971_p8 = scmp.ne.s32.totalorder %s2374_s17, %s1970_s20  ;;  %s1975_s14 = sshll.u32 %s2121_s30, 4  ;;  %s1976_s14 = int_to_ptr.vmem [resolvable:$false] %s1975_s14 }
  0xa2   : > { %s1977_s5 = scalar_lea.vmem %s1976_s14, 256  ;;  %p1978_p4 = scmp.lt.s32.totalorder %s2374_s17, %s1976_s14 }
  0xa3   : > { %p1973_p3 = pnand %p1971_p8, %p1957_p1  ;;  %p1979_p12 = scmp.lt.s32.totalorder %s1977_s5, %s1970_s20 }
  0xa5   : > { %p1974_p9 = pneg %p1973_p3  ;;  %p1980_p6 = por %p1979_p12, %p1978_p4 }
  0xa7   : > { %p1981_p13 = pnand %p1980_p6, %p1974_p9 }
  0xa9   : > { %1984 = shalt.err (!%p1981_p13)
}
  0xaa   : > { %1738 = dma.hbm_to_vmem [thread:$0]  (!%p2370_p10), %s2365_s8, 128, %s2374_s17, %s281_s2  }
  0xab   : > { %s299_s3 = sand.u32 1, %s2113_s26   ;;  %s303_s4 = scalar_lea.vmem [#allocation8], %s2360_s10 }
  0xac   : > { %s311_s12 = sshll.u32 %s303_s4, 4  ;;  %s300_s11 = scalar_lea.sflag [#allocation9], %s299_s3  ;;  %s312_s12 = int_to_ptr.vmem [resolvable:$true] %s311_s12 }
  0xad   : > { %s1985_s13 = scalar_lea.hbm %s2379_s29, 128  ;;  %s1990_s30 = scalar_lea.hbm %s2593_s1, 256 }
  0xae   : > { %p1986_p4 = scmp.ne.s32.totalorder %s2379_s29, %s1985_s13  ;;  %p1991_p0 = scmp.lt.u32.totalorder %s2379_s29, %s2593_s1 }
  0xaf   : > { %p1992_p7 = scmp.lt.u32.totalorder %s1990_s30, %s1985_s13  ;;  %p1994_p8 = scmp.lt.u32.totalorder %s1985_s13, %s2379_s29 }
  0xb0   : > { %p1988_p9 = pnand %p1986_p4, %p1957_p1 }
  0xb1   : > { %p1993_p5 = por %p1992_p7, %p1991_p0 }
  0xb2   : > { %p1989_p11 = pneg %p1988_p9 }
  0xb3   : > { %p1995_p3 = por %p1994_p8, %p1993_p5 }
  0xb5   : > { %p1996_p12 = pnand %p1995_p3, %p1989_p11 }
  0xb7   : > { %1999 = shalt.err (!%p1996_p12)
}
  0xb8   : > { %s2000_s2 = scalar_lea.vmem %s312_s12, 128  ;;  %s2122_s10 = smov [#allocation8]  }
  0xb9   : > { %p2001_p6 = scmp.ne.s32.totalorder %s312_s12, %s2000_s2  ;;  %s2005_s8 = sshll.u32 %s2122_s10, 4  ;;  %s2006_s8 = int_to_ptr.vmem [resolvable:$false] %s2005_s8 }
  0xba   : > { %s2007_s17 = scalar_lea.vmem %s2006_s8, 256  ;;  %p2008_p9 = scmp.lt.s32.totalorder %s312_s12, %s2006_s8 }
  0xbb   : > { %p2003_p13 = pnand %p2001_p6, %p1957_p1  ;;  %p2009_p2 = scmp.lt.s32.totalorder %s2007_s17, %s2000_s2 }
  0xbd   : > { %p2004_p4 = pneg %p2003_p13  ;;  %p2010_p0 = por %p2009_p2, %p2008_p9 }
  0xbf   : > { %p2011_p7 = pnand %p2010_p0, %p2004_p4 }
  0xc1   : > { %2014 = shalt.err (!%p2011_p7)
}
  0xc2   : > { %1741 = dma.hbm_to_vmem [thread:$0]  (!%p2370_p10), %s2379_s29, 128, %s312_s12, %s300_s11  }
  0xc3   : > { %p2622_p11 = scmp.ne.s32.totalorder %s2608_s28, 0 }
  0xc4   : > { %s2430_s3 = sand.u32 (!%p2622_p11), 1, %s2097_s22   ;;  %p2623_p2 = scmp.ne.s32.totalorder (!%p2622_p11), %s2618_s15, 0 }
  0xc5   : > { %320 = sbr.rel (%p2622_p11) target bundleno = 1530 (0x5fa), region = 44  ;;  %s2433_s4 = sshll.u32 (!%p2622_p11), %s2430_s3, 3 }
  0xc6   : > { %s323_s13 = scalar_lea.sflag (!%p2622_p11), [#allocation6], %s2430_s3  ;;  %s326_s9 = scalar_lea.vmem (!%p2622_p11), [#allocation5], %s2433_s4 }
  0xcc   : > { %2068 = dma.done.wait (%p2623_p2), %s323_s13, 128  }
  0xcd   : > { %2070 = vsyncadd (%p2623_p2), %s323_s13, 4294967168  ;;  %s331_s28 = sand.u32 1, %s2203_s27   ;;  %s335_s29 = scalar_lea.vmem [#allocation8], %s2433_s4 }
  0xce   : > { %s332_s7 = scalar_lea.sflag [#allocation9], %s331_s28 }
  0xcf   : > { %2072 = dma.done.wait (%p2623_p2), %s332_s7, 128  }
  0xd0   : > { %2074 = vsyncadd (%p2623_p2), %s332_s7, 4294967168  ;;  %p2624_p10 = scmp.eq.s32.totalorder %s2203_s27, 0 }
  0xd2   : > { %2076 = dma.done.wait (%p2624_p10), [#allocation9], 512   ;;  %p2625_p1 = pmov %p2624_p10 }
  0xd4   : > { %2078 = vsyncadd (%p2625_p1), [#allocation9], 4294966784  ;;  %p2626_p5 = pmov %p2625_p1 }
  0xd5   : > { %p2627_p8 = pmov %p2625_p1 }
  0xd6   : > { %2080 = dma.done.wait (%p2626_p5), [#allocation12], 528  }
  0xd7   : > { %2082 = vsyncadd (%p2627_p8), [#allocation12], 4294966768  ;;  %p2628_p3 = pmov %p2625_p1 }
  0xd8   : > { %p2629_p12 = pmov %p2625_p1 }
  0xd9   : > { %2084 = dma.done.wait (%p2628_p3), [#allocation15], 16  }
  0xda   : > { %2086 = vsyncadd (%p2629_p12), [#allocation15], 4294967280  ;;  %v2123_v0 = vmov 0.0|0.0   ;;  %vm2124_vm0 = vmmov 0   ;;  %v2125_v1 = vmov 0.0   ;;  %vm401_vm1 = vcmask 261120  }
  0xdb   : > { %1682 = vmatprep.subr.bf16.mxu0 %v2123_v0  ;;  %1617 = vmatprep.mubr.msk.f32.mxu0 %vm2124_vm0, %v2125_v1  ;;  %494 = vst.msk [vmem:[#allocation4] sm:$0xff] %vm401_vm1, %v2125_v1  ;;  %v496_v2 = vld [vmem:[#allocation10] sm:$0xff]  ;;  %v497_v3 = vld [vmem:[#allocation10 + $0x8] sm:$0xff]  ;;  %v498_v4 = vld [vmem:[#allocation10 + $0x10] sm:$0xff]  ;;  %s2126_s27 = smov 96   ;;  %vm476_vm2 = vcmask 64512  }
  0xdc   : > { %1688 = vmatprep.subr.bf16.mxu1 %v2123_v0  ;;  %1628 = vmatprep.mubr.msk.f32.mxu1 %vm2124_vm0, %v2125_v1  ;;  %v1823_v5 = vpack.i.bf16 %v497_v3, %v496_v2  ;;  %v499_v6 = vld [vmem:[#allocation10 + $0x18] sm:$0xff]  ;;  %v1683_v7 = vpack.c.bf16 %v497_v3, %v496_v2  ;;  %v1558_v8 = vld [vmem:[#allocation11] ss:$0 sm:$0xff]  ;;  %s2127_s15 = smov 120   ;;  %s2128_s12 = smov 112   ;;  %vm1117_vm3 = vcmask 130112  }
  0xdd   : > { %v1828_v9 = vpack.i.bf16 %v499_v6, %v498_v4  ;;  %v1686_v10 = vpack.c.bf16 %v499_v6, %v498_v4  ;;  %522 = vrot.lane.b32.xlu1 %v1558_v8, %s2126_s27  ;;  %v389_v11 = vld [vmem:[%s326_s9] sm:$0xff]  ;;  %v495_v20 = vld [vmem:[%s335_s29] sm:$0xff]  ;;  %s2129_s11 = smov 104   ;;  %s2130_s20 = smov 88   ;;  %vm1201_vm4 = vcmask 195712   ;;  %vm1285_vm5 = vcmask 261312  }
  0xde   : > { %1824 = vrot.lane.b32.xlu0 %v1823_v5, %s2126_s27  ;;  %1684 = vmatpush3.bf16.msra.mxu0 %v1683_v7  ;;  %s2131_s30 = smov 80   ;;  %s2132_s14 = smov 72  }
  0xdf   : > { %1685 = vmatprep.subr.bf16.mxu0 %v2123_v0  ;;  %s2133_s5 = smov 8   ;;  %s2134_s2 = smov 24  }
  0xe0   : > { %s2135_s10 = smov 16   ;;  %s1575_s8 = sshll.u32 %s2105_s24, 7 }
  0xe1   : > { %s384_s17 = scalar_lea.vmem [#allocation16], %s2433_s4  ;;  %s2542_s7 = scalar_lea.hbm %s2598_s6, %s1575_s8 }
  0xe2   : > { %1829 = vrot.lane.b32.xlu0 %v1828_v9, %s2126_s27  ;;  %1687 = vmatpush3.bf16.msra.mxu0 %v1686_v10  ;;  %s1391_s13 = sshll.u32 %s384_s17, 4  ;;  %s1377_s29 = scalar_lea.sflag [#allocation7], %s2430_s3  ;;  %s2544_s13 = int_to_ptr.vmem [resolvable:$true] %s1391_s13 }
  0xe3   : > { %1641 = vmatprep.subr.mxu0 %v2125_v1  ;;  %p2630_p13 = scmp.ne.s32.totalorder %s2619_s16, 0  ;;  %s2136_s24 = smov [#allocation16]  }
  0xe4   : > { %s2019_s4 = sshll.u32 %s2136_s24, 4  ;;  %s2020_s4 = int_to_ptr.vmem [resolvable:$false] %s2019_s4 }
  0xe5   : > { %1618 = vmatmul.mubr.msk.f32.vlgmr.msra.gmra.mrb[0].mxu0 %vm401_vm1, %v389_v11  ;;  %p2022_p0 = scmp.lt.s32.totalorder %s2544_s13, %s2020_s4 }
  0xe6   : > { %1643 = vmatprep.mubr.msk.f32.mxu0 %vm2124_vm0, %v2125_v1 }
 0x14f   : > { %v523_v25 = vpop.permute.xlu1 %522 }
 0x150   : > { %v1825_v12 = vpop.permute.xlu0 %1824 }
 0x151   : > { %v1827_v13 = vunpack.i.h.bf16 %v1825_v12  ;;  %v1826_v14 = vunpack.i.l.bf16 %v1825_v12 }
 0x153   : > { %v1689_v15 = vpack.c.bf16 %v1827_v13, %v1826_v14 }
 0x154   : > { %v1830_v16 = vpop.permute.xlu0 %1829 }
 0x155   : > { %v1832_v17 = vunpack.i.h.bf16 %v1830_v16  ;;  %v1831_v18 = vunpack.i.l.bf16 %v1830_v16  ;;  %1690 = vmatpush3.bf16.msra.mxu1 %v1689_v15 }
 0x156   : > { %1691 = vmatprep.subr.bf16.mxu1 %v2123_v0 }
 0x157   : > { %v1692_v19 = vpack.c.bf16 %v1832_v17, %v1831_v18 }
 0x159   : > { %1693 = vmatpush3.bf16.msra.mxu1 %v1692_v19 }
 0x15a   : > { %1631 = vmatprep.subr.mxu1 %v2125_v1 }
 0x15c   : > { %1629 = vmatmul.mubr.msk.f32.vlgmr.msra.gmra.mrb[0].mxu1 %vm401_vm1, %v495_v20 }
 0x15d   : > { %1633 = vmatprep.mubr.msk.f32.mxu1 %vm2124_vm0, %v2125_v1 }
 0x1b8   : > { %v471_v21 = vpop.f32.mrb[0].mxu0 }
 0x1b9   : > { %v472_v22 = vadd.f32 %v1558_v8, %v471_v21  ;;  %v1619_v23 = vpop.f32.mrb[1].mxu0 }
 0x1bb   : > { %v475_v24 = vmul.f32 0.35355338, %v472_v22 }
 0x1bd   : > { %477 = vst.msk [vmem:[#allocation2] sm:$0xff] %vm476_vm2, %v475_v24  ;;  %479 = vrot.lane.b32.xlu1 %v475_v24, %s2127_s15  ;;  %484 = vrot.lane.b32.xlu0 %v475_v24, %s2128_s12 }
 0x1c1   : > { %489 = vrot.lane.b32.xlu1 %v475_v24, %s2129_s11  ;;  %v1032_v24 = vld [vmem:[#allocation4] sm:$0xff] }
 0x1c4   : > { %v599_v31 = vld [vmem:[#allocation2] sm:$0xff] }
 0x22f   : > { %v595_v26 = vpop.f32.mrb[0].mxu1  ;;  %v480_v27 = vpop.permute.xlu1 %479 }
 0x230   : > { %v596_v28 = vadd.f32 %v595_v26, %v523_v25  ;;  %v1630_v29 = vpop.f32.mrb[1].mxu1  ;;  %483 = vst.msk [vmem:[#allocation2 + $0x8] sm:$0xff] %vm476_vm2, %v480_v27  ;;  %v485_v30 = vpop.permute.xlu0 %484 }
 0x231   : > { %488 = vst.msk [vmem:[#allocation2 + $0x10] sm:$0xff] %vm476_vm2, %v485_v30 }
 0x232   : > { %1632 = vmatpush3.xpose.msk.msra.mxu1 %vm476_vm2, %v596_v28  ;;  %680 = vrot.lane.b32.xlu0 %v596_v28, %s2127_s15  ;;  %s2021_s15 = scalar_lea.vmem %s2020_s4, 256 }
 0x233   : > { %761 = vrot.lane.b32.xlu1 %v596_v28, %s2128_s12  ;;  %v490_v32 = vpop.permute.xlu1 %489  ;;  %1636 = vmatprep.subr.mxu1 %v2125_v1 }
 0x234   : > { %493 = vst.msk [vmem:[#allocation2 + $0x18] sm:$0xff] %vm476_vm2, %v490_v32 }
 0x235   : > { %1634 = vmatmul.mubr.msk.f32.vlgmr.msra.gmra.mrb[2].mxu1 %vm476_vm2, %v599_v31 }
 0x236   : > { %842 = vrot.lane.b32.xlu0 %v596_v28, %s2129_s11  ;;  %1638 = vmatprep.mubr.msk.f32.mxu1 %vm2124_vm0, %v2125_v1 }
 0x237   : > { %1035 = vrot.lane.b32.xlu1 %v596_v28, %s2130_s20  ;;  %v679_v35 = vld [vmem:[#allocation2 + $0x8] sm:$0xff] }
 0x238   : > { %v760_v36 = vld [vmem:[#allocation2 + $0x10] sm:$0xff] }
 0x23a   : > { %956 = vrot.lane.b32.xlu0 %v596_v28, %s2126_s27  ;;  %s2015_s27 = scalar_lea.vmem %s2544_s13, 128 }
 0x23b   : > { %1119 = vrot.lane.b32.xlu1 %v596_v28, %s2131_s30  ;;  %v841_v38 = vld [vmem:[#allocation2 + $0x18] sm:$0xff]  ;;  %p2016_p6 = scmp.ne.s32.totalorder %s2544_s13, %s2015_s27  ;;  %p2023_p7 = scmp.lt.s32.totalorder %s2021_s15, %s2015_s27 }
 0x23d   : > { %p2017_p4 = pnand %p2016_p6, %p2630_p13  ;;  %p2024_p11 = por %p2023_p7, %p2022_p0 }
 0x23e   : > { %1203 = vrot.lane.b32.xlu0 %v596_v28, %s2132_s14 }
 0x23f   : > { %p2018_p9 = pneg %p2017_p4 }
 0x241   : > { %p2025_p2 = pnand %p2024_p11, %p2018_p9 }
 0x2a4   : > { %v681_v33 = vpop.permute.xlu0 %680 }
 0x2a5   : > { %v762_v34 = vpop.permute.xlu1 %761  ;;  %1637 = vmatpush3.xpose.msk.msra.mxu1 %vm476_vm2, %v681_v33 }
 0x2a6   : > { %1642 = vmatpush3.xpose.msk.msra.mxu0 %vm476_vm2, %v762_v34  ;;  %1646 = vmatprep.subr.mxu1 %v2125_v1  ;;  %v1291_v34 = vld [vmem:[#allocation13] sm:$0xff] }
 0x2a7   : > { %1651 = vmatprep.subr.mxu0 %v2125_v1 }
 0x2a8   : > { %v843_v37 = vpop.permute.xlu0 %842  ;;  %1639 = vmatmul.mubr.msk.f32.vlgmr.msra.gmra.mrb[4].mxu1 %vm476_vm2, %v679_v35 }
 0x2a9   : > { %1644 = vmatmul.mubr.msk.f32.vlgmr.msra.gmra.mrb[2].mxu0 %vm476_vm2, %v760_v36  ;;  %1647 = vmatpush3.xpose.msk.msra.mxu1 %vm476_vm2, %v843_v37  ;;  %v1036_v39 = vpop.permute.xlu1 %1035  ;;  %v1293_v36 = vld [vmem:[#allocation13 + $0x10] sm:$0xff]  ;;  %v1294_v37 = vld [vmem:[#allocation13 + $0x18] sm:$0xff] }
 0x2aa   : > { %1648 = vmatprep.mubr.msk.f32.mxu1 %vm2124_vm0, %v2125_v1  ;;  %1656 = vmatprep.subr.mxu1 %v2125_v1 }
 0x2ab   : > { %1653 = vmatprep.mubr.msk.f32.mxu0 %vm2124_vm0, %v2125_v1 }
 0x2ac   : > { %v957_v40 = vpop.permute.xlu0 %956  ;;  %1649 = vmatmul.mubr.msk.f32.vlgmr.msra.gmra.mrb[6].mxu1 %vm476_vm2, %v841_v38  ;;  %v1698_v38 = vpack.c.bf16 %v1294_v37, %v1293_v36 }
 0x2ad   : > { %1652 = vmatpush3.msra.mxu0 %v957_v40  ;;  %1657 = vmatpush3.msra.mxu1 %v1036_v39  ;;  %v1120_v20 = vpop.permute.xlu1 %1119 }
 0x2ae   : > { %1658 = vmatprep.mubr.msk.f32.mxu1 %vm2124_vm0, %v2125_v1  ;;  %1661 = vmatprep.subr.mxu0 %v2125_v1 }
 0x2af   : > { %1666 = vmatprep.subr.mxu1 %v2125_v1 }
 0x2b0   : > { %v1204_v21 = vpop.permute.xlu0 %1203 }
 0x308   : > { %v673_v41 = vpop.f32.mrb[2].mxu1 }
 0x309   : > { %677 = vst.msk [vmem:[#allocation3] sm:$0xff] %vm476_vm2, %v673_v41  ;;  %v1635_v42 = vpop.f32.mrb[3].mxu1 }
 0x310   : > { %v921_v50 = vld [vmem:[#allocation3] sm:$0xff] }
 0x311   : > { %v925_v54 = vsel %vm476_vm2, %v921_v50, -inf }
 0x37b   : > { %v753_v43 = vpop.f32.mrb[4].mxu1 }
 0x37c   : > { %758 = vst.msk [vmem:[#allocation3 + $0x8] sm:$0xff] %vm476_vm2, %v753_v43  ;;  %v834_v44 = vpop.f32.mrb[2].mxu0  ;;  %v1640_v45 = vpop.f32.mrb[5].mxu1 }
 0x37d   : > { %839 = vst.msk [vmem:[#allocation3 + $0x10] sm:$0xff] %vm476_vm2, %v834_v44  ;;  %v1645_v46 = vpop.f32.mrb[3].mxu0 }
 0x37f   : > { %v915_v47 = vpop.f32.mrb[6].mxu1 }
 0x380   : > { %920 = vst.msk [vmem:[#allocation3 + $0x18] sm:$0xff] %vm476_vm2, %v915_v47  ;;  %v1650_v48 = vpop.f32.mrb[7].mxu1 }
 0x381   : > { %v1572_v48 = vld [vmem:[#allocation14] ss:$0 sm:$0xff] }
 0x383   : > { %v922_v49 = vld [vmem:[#allocation3 + $0x8] sm:$0xff] }
 0x384   : > { %v923_v51 = vld [vmem:[#allocation3 + $0x10] sm:$0xff]  ;;  %v926_v52 = vsel %vm476_vm2, %v922_v49, -inf }
 0x385   : > { %v927_v55 = vsel %vm476_vm2, %v923_v51, -inf  ;;  %v929_v57 = vmax.f32 %v925_v54, %v926_v52 }
 0x387   : > { %v924_v53 = vld [vmem:[#allocation3 + $0x18] sm:$0xff] }
 0x388   : > { %v928_v56 = vsel %vm476_vm2, %v924_v53, -inf }
 0x389   : > { %v930_v58 = vmax.f32 %v927_v55, %v928_v56 }
 0x38b   : > { %v931_v59 = vmax.f32 %v929_v57, %v930_v58 }
 0x38d   : > { %v932_v60 = vsub.f32 %v921_v50, %v931_v59  ;;  %v933_v61 = vsub.f32 %v922_v49, %v931_v59  ;;  %v934_v62 = vsub.f32 %v923_v51, %v931_v59  ;;  %v935_v63 = vsub.f32 %v924_v53, %v931_v59 }
 0x38f   : > { %v936_v2 = vmul.f32 1.442695, %v932_v60  ;;  %v938_v3 = vmul.f32 1.442695, %v933_v61  ;;  %v940_v4 = vmul.f32 1.442695, %v934_v62 }
 0x390   : > { %v942_v5 = vmul.f32 1.442695, %v935_v63 }
 0x391   : > { %1833 = vpow2.f32 %v936_v2 }
 0x392   : > { %1835 = vpow2.f32 %v938_v3 }
 0x393   : > { %1837 = vpow2.f32 %v940_v4 }
 0x394   : > { %1839 = vpow2.f32 %v942_v5 }
 0x39b   : > { %v1834_v6 = vpop.eup %1833 }
 0x39c   : > { %v1836_v7 = vpop.eup %1835  ;;  %v944_v8 = vsel %vm476_vm2, %v1834_v6, 0.0 }
 0x39d   : > { %v1838_v9 = vpop.eup %1837  ;;  %v945_v10 = vsel %vm476_vm2, %v1836_v7, 0.0 }
 0x39e   : > { %v1840_v11 = vpop.eup %1839  ;;  %v946_v12 = vadd.f32 %v945_v10, %v944_v8  ;;  %v947_v13 = vsel %vm476_vm2, %v1838_v9, 0.0 }
 0x39f   : > { %v949_v15 = vsel %vm476_vm2, %v1840_v11, 0.0 }
 0x3a0   : > { %v948_v14 = vadd.f32 %v947_v13, %v946_v12 }
 0x3a2   : > { %v950_v16 = vadd.f32 %v949_v15, %v948_v14 }
 0x3a4   : > { %1841 = vrcp.f32 %v950_v16 }
 0x3ae   : > { %v1842_v17 = vpop.eup %1841 }
 0x3af   : > { %v952_v18 = vmul.f32 %v1842_v17, %v1834_v6  ;;  %v953_v19 = vmul.f32 %v1842_v17, %v1836_v7  ;;  %v954_v22 = vmul.f32 %v1842_v17, %v1838_v9  ;;  %v955_v23 = vmul.f32 %v1842_v17, %v1840_v11 }
 0x3b1   : > { %1654 = vmatmul.mubr.msk.f32.vlgmr.msra.gmra.mrb[4].mxu0 %vm476_vm2, %v952_v18  ;;  %1659 = vmatmul.mubr.msk.f32.vlgmr.msra.gmra.mrb[8].mxu1 %vm476_vm2, %v953_v19 }
 0x3b2   : > { %1662 = vmatpush3.msra.mxu0 %v1120_v20  ;;  %1667 = vmatpush3.msra.mxu1 %v1204_v21 }
 0x3b3   : > { %1663 = vmatprep.mubr.msk.f32.mxu0 %vm2124_vm0, %v2125_v1  ;;  %1668 = vmatprep.mubr.msk.f32.mxu1 %vm2124_vm0, %v2125_v1 }
 0x3b4   : > { %1694 = vmatprep.subr.bf16.mxu0 %v2123_v0 }
 0x3b5   : > { %1664 = vmatmul.mubr.msk.f32.vlgmr.msra.gmra.mrb[6].mxu0 %vm476_vm2, %v954_v22  ;;  %1669 = vmatmul.mubr.msk.f32.vlgmr.msra.gmra.mrb[10].mxu1 %vm476_vm2, %v955_v23 }
 0x3b6   : > { %1679 = vmatprep.mubr.msk.f32.mxu0 %vm2124_vm0, %v2125_v1  ;;  %v1292_v1 = vld [vmem:[#allocation13 + $0x8] sm:$0xff] }
 0x3b7   : > { %v1695_v35 = vpack.c.bf16 %v1292_v1, %v1291_v34 }
 0x3b9   : > { %1696 = vmatpush3.bf16.msra.mxu0 %v1695_v35 }
 0x3ba   : > { %1697 = vmatprep.subr.bf16.mxu0 %v2123_v0 }
 0x3bd   : > { %1699 = vmatpush3.bf16.msra.mxu0 %v1698_v38 }
 0x484   : > { %v1028_v25 = vpop.f32.mrb[4].mxu0  ;;  %v1107_v26 = vpop.f32.mrb[8].mxu1 }
 0x485   : > { %v1033_v27 = vadd.f32 %v1032_v24, %v1028_v25  ;;  %1113 = vrot.lane.b32.xlu1 %v1107_v26, %s2133_s5  ;;  %v1655_v28 = vpop.f32.mrb[5].mxu0  ;;  %v1660_v29 = vpop.f32.mrb[9].mxu1 }
 0x487   : > { %1034 = vst.msk [vmem:[#allocation4] sm:$0xff] %vm476_vm2, %v1033_v27 }
 0x488   : > { %v1191_v30 = vpop.f32.mrb[6].mxu0  ;;  %v1275_v31 = vpop.f32.mrb[10].mxu1 }
 0x489   : > { %1281 = vrot.lane.b32.xlu1 %v1275_v31, %s2134_s2  ;;  %v1670_v32 = vpop.f32.mrb[11].mxu1  ;;  %1197 = vrot.lane.b32.xlu0 %v1191_v30, %s2135_s10  ;;  %v1665_v33 = vpop.f32.mrb[7].mxu0 }
 0x48e   : > { %v1111_v40 = vld [vmem:[#allocation4] sm:$0xff] }
 0x4f7   : > { %v1114_v39 = vpop.permute.xlu1 %1113 }
 0x4f8   : > { %v1116_v41 = vadd.f32 %v1114_v39, %v1111_v40 }
 0x4fa   : > { %1118 = vst.msk [vmem:[#allocation4] sm:$0xff] %vm1117_vm3, %v1116_v41 }
 0x4fb   : > { %v1198_v43 = vpop.permute.xlu0 %1197  ;;  %v1282_v45 = vpop.permute.xlu1 %1281 }
 0x501   : > { %v1195_v42 = vld [vmem:[#allocation4] sm:$0xff] }
 0x502   : > { %v1200_v44 = vadd.f32 %v1198_v43, %v1195_v42 }
 0x504   : > { %1202 = vst.msk [vmem:[#allocation4] sm:$0xff] %vm1201_vm4, %v1200_v44 }
 0x50b   : > { %v1279_v46 = vld [vmem:[#allocation4] sm:$0xff] }
 0x50c   : > { %v1284_v47 = vadd.f32 %v1282_v45, %v1279_v46 }
 0x50e   : > { %1286 = vst.msk [vmem:[#allocation4] sm:$0xff] %vm1285_vm5, %v1284_v47 }
 0x515   : > { %v1290_v0 = vld [vmem:[#allocation4] sm:$0xff] }
 0x516   : > { %1680 = vmatmul.mubr.msk.f32.vlgmr.msra.gmra.mrb[8].mxu0 %vm401_vm1, %v1290_v0 }
 0x5e9   : > { %v1371_v49 = vpop.f32.mrb[8].mxu0 }
 0x5ea   : > { %v1372_v50 = vadd.f32 %v1572_v48, %v1371_v49  ;;  %v1681_v51 = vpop.f32.mrb[9].mxu0 }
 0x5ec   : > { %1375 = vst.msk [vmem:[%s384_s17] sm:$0xff] %vm401_vm1, %v1372_v50 }
 0x5ed   : > { %2028 = shalt.err (!%p2025_p2)
}
 0x5ee   : > { %s2029_s3 = scalar_lea.hbm %s2542_s7, 128  ;;  %s2033_s20 = scalar_lea.hbm %s2598_s6, 256 }
 0x5ef   : > { %p2030_p10 = scmp.ne.s32.totalorder %s2542_s7, %s2029_s3  ;;  %p2034_p8 = scmp.lt.u32.totalorder %s2542_s7, %s2598_s6 }
 0x5f0   : > { %p2035_p3 = scmp.lt.u32.totalorder %s2033_s20, %s2029_s3  ;;  %p2037_p6 = scmp.lt.u32.totalorder %s2029_s3, %s2542_s7 }
 0x5f1   : > { %p2031_p1 = pnand %p2030_p10, %p2630_p13 }
 0x5f2   : > { %p2036_p12 = por %p2035_p3, %p2034_p8 }
 0x5f3   : > { %p2032_p5 = pneg %p2031_p1 }
 0x5f4   : > { %p2038_p4 = por %p2037_p6, %p2036_p12 }
 0x5f6   : > { %p2039_p9 = pnand %p2038_p4, %p2032_p5 }
 0x5f8   : > { %2042 = shalt.err (!%p2039_p9)
}
 0x5f9   : > { %1720 = dma.vmem_to_hbm [thread:$0]  (%p2630_p13), %s2544_s13, 128, %s2542_s7, %s1377_s29  }
 0x5fa PF: > { %s1403_s5 = sand.u32 1, %s2093_s21   ;;  %p2631_p0 = scmp.ne.s32.totalorder %s2620_s19, 0 }
 0x5fb   : > { %p2632_p7 = scmp.ge.s32.totalorder %s2113_s26, 2  ;;  %s1404_s2 = scalar_lea.sflag [#allocation7], %s1403_s5 }
 0x5fd   : > { %p1743_p11 = pnand %p2632_p7, %p2631_p0 }
 0x5ff   : > { %2088 = dma.done.wait (!%p1743_p11), %s1404_s2, 128  }
 0x600   : > { %2090 = vsyncadd (!%p1743_p11), %s1404_s2, 4294967168  ;;  %s27_s26 = sadd.s32 1, %s2113_s26   ;;  %s2633_s16 = sld [smem:[#allocation23_spill]] }
 0x601   : > { %p24_p2 = scmp.ge.s32.totalorder %s27_s26, 4   ;;  %s2634_s21 = smov %s2097_s22 }
 0x602   : > { %s2635_s22 = smov %s2101_s23  ;;  %s2636_s23 = smov %s2351_s18 }
 0x603   : > { %s2637_s24 = smov %s2109_s25  ;;  %26 = sbr.rel (!%p24_p2) target bundleno = 15 (0xf), region = 135 }
 0x606   : > { %s2638_s25 = smov %s2633_s16 }
 0x60a   :  { %1409 = vsyncpa [#allocation6], 1 }
 0x60b   :  { %1411 = vsyncpa [#allocation6 + $0x1], 1 }
 0x60c   :  { %1412 = vsyncpa [#allocation9], 1 }
 0x60d   :  { %1414 = vsyncpa [#allocation9 + $0x1], 1 }
 0x60e   :  { %1415 = vsyncpa [#allocation12], 1 }
 0x60f   :  { %1416 = vsyncpa [#allocation15], 1 }
 0x610   :  { %1417 = vsyncpa [#allocation7], 1 }
 0x611   :  { %1419 = vsyncpa [#allocation7 + $0x1], 1 }

// kernel: tpu_custom_call.1
= control target key start
LH: loop header
LB: loop body
LE: loop exit
PB: predicated region body
PF: predicated region fallthrough
CT: control target
= control target key end

     0   :  { %s2592_s0 = inlined_call_operand.hbm [shape: f32[2,8,32], index: 0, kind: input, shape index: {}]   ;;  %s2593_s1 = inlined_call_operand.hbm [shape: f32[2,8,32], index: 1, kind: input, shape index: {}]   ;;  %s2594_s2 = inlined_call_operand.hbm [shape: f32[32,96], index: 2, kind: input, shape index: {}]   ;;  %s2595_s3 = inlined_call_operand.hbm [shape: f32[1,96], index: 3, kind: input, shape index: {}]   ;;  %s2596_s4 = inlined_call_operand.hbm [shape: f32[32,32], index: 4, kind: input, shape index: {}]   ;;  %s2597_s5 = inlined_call_operand.hbm [shape: f32[1,32], index: 5, kind: input, shape index: {}]   ;;  %s2598_s6 = inlined_call_operand.hbm [shape: f32[2,8,32], index: 6, kind: output, shape index: {}]  }
   0x1   :  { %2604 = sst [smem:[#allocation24_spill]] %s2594_s2 }
   0x2   :  { %2605 = sst [smem:[#allocation25_spill]] %s2595_s3 }
   0x3   :  { %2606 = sst [smem:[#allocation26_spill]] %s2596_s4 }
   0x4   :  { %2607 = sst [smem:[#allocation27_spill]] %s2597_s5 }
   0x5   :  { %11 = vsyncpa [#allocation6], 0 }
   0x6   :  { %13 = vsyncpa [#allocation6 + $0x1], 0 }
   0x7   :  { %14 = vsyncpa [#allocation9], 0 }
   0x8   :  { %16 = vsyncpa [#allocation9 + $0x1], 0 }
   0x9   :  { %17 = vsyncpa [#allocation12], 0 }
   0xa   :  { %18 = vsyncpa [#allocation15], 0 }
   0xb   :  { %19 = vsyncpa [#allocation7], 0 }
   0xc   :  { %21 = vsyncpa [#allocation7 + $0x1], 0  ;;  %s2172_s21 = smov 0   ;;  %s2174_s22 = smov 0  }
   0xd   :  { %s2176_s23 = smov 0   ;;  %s2178_s24 = smov 0  }
   0xe   :  { %s2180_s25 = smov 0   ;;  %s2182_s26 = smov 0  }
   0xf LB: > { %s2203_s27 = sadd.s32 4294967295, %s2113_s26   ;;  %p1538_p0 = scmp.ge.s32.totalorder %s2113_s26, 1  ;;  %s2113_s26 = sphi %s2182_s26, %s27_s26   ;;  %s2109_s25 = sphi %s2180_s25, %s2638_s25   ;;  %s2105_s24 = sphi %s2178_s24, %s2637_s24   ;;  %s2101_s23 = sphi %s2176_s23, %s2636_s23   ;;  %s2097_s22 = sphi %s2174_s22, %s2635_s22   ;;  %s2093_s21 = sphi %s2172_s21, %s2634_s21  }
  0x10   : > { %p2599_p1 = scmp.eq.s32.totalorder %s2203_s27, 0  ;;  %p219_p2 = scmp.lt.s32.totalorder %s2113_s26, 3 }
  0x11   : > { %s2115_s29 = smov [#allocation10]   ;;  %s2116_s8 = smov [#allocation11]  }
  0x12   : > { %p2208_p3 = pnand %p1538_p0, %p219_p2  ;;  %s231_s30 = sshll.u32 %s2115_s29, 4  ;;  %s2212_s30 = int_to_ptr.vmem [resolvable:$true] %s231_s30 }
  0x13   : > { %s245_s9 = sshll.u32 %s2116_s8, 4  ;;  %s2117_s10 = smov [#allocation13]   ;;  %s2223_s9 = int_to_ptr.vmem [resolvable:$true] %s245_s9 }
  0x14   : > { %s2608_s28 = scalar_select %p2208_p3, 1, 0 }
  0x15   : > { %p1722_p4 = pneg %p2208_p3  ;;  %s2225_s11 = sshll.u32 %s2117_s10, 4  ;;  %s256_s11 = int_to_ptr.vmem [resolvable:$true] %s2225_s11 }
  0x16   : > { %s2610_s2 = sld [smem:[#allocation24_spill]] }
  0x17   : > { %p2219_p6 = pnand %p1722_p4, %p2599_p1 }
  0x19   : > { %p2235_p8 = pneg %p2219_p6 }
  0x1c   : > { %s1843_s14 = scalar_lea.hbm %s2610_s2, 512 }
  0x1d   : > { %p1844_p7 = scmp.ne.s32.totalorder %s2610_s2, %s1843_s14  ;;  %p1850_p11 = scmp.lt.u32.totalorder %s1843_s14, %s2610_s2 }
  0x1f   : > { %p1846_p9 = pnand %p2235_p8, %p1844_p7 }
  0x21   : > { %p1847_p10 = pneg %p1846_p9 }
  0x23   : > { %p1852_p12 = pnand %p1850_p11, %p1847_p10 }
  0x25   : > { %1855 = shalt.err (!%p1852_p12)
}
  0x26   : > { %s1856_s20 = scalar_lea.vmem %s2212_s30, 512  ;;  %p1864_p4 = scmp.lt.s32.totalorder %s2212_s30, %s2212_s30 }
  0x27   : > { %p1857_p13 = scmp.ne.s32.totalorder %s2212_s30, %s1856_s20  ;;  %p1865_p5 = scmp.lt.s32.totalorder %s1856_s20, %s1856_s20 }
  0x29   : > { %p1859_p0 = pnand %p1857_p13, %p2235_p8  ;;  %p1866_p7 = por %p1865_p5, %p1864_p4 }
  0x2b   : > { %p1860_p2 = pneg %p1859_p0 }
  0x2d   : > { %p1867_p9 = pnand %p1866_p7, %p1860_p2 }
  0x2f   : > { %1870 = shalt.err (!%p1867_p9)
}
  0x30   : > { %s2118_s29 = smov 128   ;;  %s2119_s8 = smov 8  }
  0x31   : > { %1725 = dma.hbm_to_vmem [thread:$0]  (!%p2219_p6), %s2610_s2, 512, %s2212_s30, [#allocation9], %s2118_s29, %s2118_s29, %s2119_s8  }
  0x32   : > { %s2612_s3 = sld [smem:[#allocation25_spill]] }
  0x38   : > { %s1871_s15 = scalar_lea.hbm %s2612_s3, 16 }
  0x39   : > { %p1872_p5 = scmp.ne.s32.totalorder %s2612_s3, %s1871_s15  ;;  %p1878_p12 = scmp.lt.u32.totalorder %s1871_s15, %s2612_s3 }
  0x3b   : > { %p1874_p10 = pnand %p1872_p5, %p2235_p8 }
  0x3d   : > { %p1875_p11 = pneg %p1874_p10 }
  0x3f   : > { %p1880_p13 = pnand %p1878_p12, %p1875_p11 }
  0x41   : > { %1883 = shalt.err (!%p1880_p13)
}
  0x42   : > { %s1884_s30 = scalar_lea.vmem %s2223_s9, 16  ;;  %s1891_s10 = scalar_lea.vmem %s2223_s9, 32 }
  0x43   : > { %p1885_p0 = scmp.ne.s32.totalorder %s2223_s9, %s1884_s30  ;;  %p1892_p7 = scmp.lt.s32.totalorder %s2223_s9, %s2223_s9 }
  0x44   : > { %p1893_p9 = scmp.lt.s32.totalorder %s1891_s10, %s1884_s30 }
  0x45   : > { %p1887_p2 = pnand %p1885_p0, %p2235_p8 }
  0x46   : > { %p1894_p5 = por %p1893_p9, %p1892_p7 }
  0x47   : > { %p1888_p4 = pneg %p1887_p2 }
  0x49   : > { %p1895_p10 = pnand %p1894_p5, %p1888_p4 }
  0x4b   : > { %1898 = shalt.err (!%p1895_p10)
}
  0x4c   : > { %1728 = dma.hbm_to_vmem [thread:$0]  (!%p2219_p6), %s2612_s3, 16, %s2223_s9, [#allocation12]  }
  0x4d   : > { %s2613_s4 = sld [smem:[#allocation26_spill]] }
  0x53   : > { %s1899_s16 = scalar_lea.hbm %s2613_s4, 512 }
  0x54   : > { %p1900_p11 = scmp.ne.s32.totalorder %s2613_s4, %s1899_s16  ;;  %p1906_p0 = scmp.lt.u32.totalorder %s1899_s16, %s2613_s4 }
  0x56   : > { %p1902_p12 = pnand %p1900_p11, %p2235_p8 }
  0x58   : > { %p1903_p13 = pneg %p1902_p12 }
  0x5a   : > { %p1908_p2 = pnand %p1906_p0, %p1903_p13 }
  0x5c   : > { %1911 = shalt.err (!%p1908_p2)
}
  0x5d   : > { %s1912_s10 = scalar_lea.vmem %s256_s11, 512  ;;  %p1920_p5 = scmp.lt.s32.totalorder %s256_s11, %s256_s11 }
  0x5e   : > { %p1913_p4 = scmp.ne.s32.totalorder %s256_s11, %s1912_s10  ;;  %p1921_p10 = scmp.lt.s32.totalorder %s1912_s10, %s1912_s10 }
  0x60   : > { %p1915_p7 = pnand %p1913_p4, %p2235_p8  ;;  %p1922_p1 = por %p1921_p10, %p1920_p5 }
  0x62   : > { %p1916_p9 = pneg %p1915_p7 }
  0x64   : > { %p1923_p3 = pnand %p1922_p1, %p1916_p9 }
  0x66   : > { %1926 = shalt.err (!%p1923_p3)
}
  0x67   : > { %1731 = dma.hbm_to_vmem [thread:$0]  (!%p2219_p6), %s2613_s4, 512, %s256_s11, [#allocation12], %s2118_s29, %s2118_s29, %s2119_s8  }
  0x68   : > { %s2120_s13 = smov [#allocation14]   ;;  %s2614_s5 = sld [smem:[#allocation27_spill]] }
  0x69   : > { %s269_s14 = sshll.u32 %s2120_s13, 4  ;;  %s270_s14 = int_to_ptr.vmem [resolvable:$true] %s269_s14 }
  0x6e   : > { %s1927_s18 = scalar_lea.hbm %s2614_s5, 16 }
  0x6f   : > { %p1928_p1 = scmp.ne.s32.totalorder %s2614_s5, %s1927_s18  ;;  %p1934_p12 = scmp.lt.u32.totalorder %s1927_s18, %s2614_s5 }
  0x71   : > { %p1930_p3 = pnand %p1928_p1, %p2235_p8 }
  0x73   : > { %p1931_p11 = pneg %p1930_p3 }
  0x75   : > { %p1936_p13 = pnand %p1934_p12, %p1931_p11 }
  0x77   : > { %1939 = shalt.err (!%p1936_p13)
}
  0x78   : > { %s1940_s11 = scalar_lea.vmem %s270_s14, 16  ;;  %s1947_s29 = scalar_lea.vmem %s270_s14, 32 }
  0x79   : > { %p1941_p0 = scmp.ne.s32.totalorder %s270_s14, %s1940_s11  ;;  %p1948_p7 = scmp.lt.s32.totalorder %s270_s14, %s270_s14 }
  0x7a   : > { %p1949_p9 = scmp.lt.s32.totalorder %s1947_s29, %s1940_s11 }
  0x7b   : > { %p1943_p2 = pnand %p1941_p0, %p2235_p8 }
  0x7c   : > { %p1950_p5 = por %p1949_p9, %p1948_p7 }
  0x7d   : > { %p1944_p4 = pneg %p1943_p2 }
  0x7f   : > { %p1951_p10 = pnand %p1950_p5, %p1944_p4 }
  0x81   : > { %1954 = shalt.err (!%p1951_p10)
}
  0x82   : > { %1734 = dma.hbm_to_vmem [thread:$0]  (!%p2219_p6), %s2614_s5, 16, %s270_s14, [#allocation15]  }
  0x83   : > { %s1537_s17 = sadd.s32 4294967294, %s2113_s26   ;;  %s46_s12 = sadd.s32 1, %s2109_s25 }
  0x84   : > { %p48_p8 = scmp.ge.s32.totalorder %s46_s12, 2  ;;  %s55_s7 = sadd.s32 1, %s2101_s23 }
  0x85   : > { %p62_p1 = scmp.ne.s32.totalorder %s2101_s23, %s2097_s22  ;;  %p63_p3 = scmp.eq.s32.totalorder %s2113_s26, 0 }
  0x86   : > { %s2640_s12 = smov (%p48_p8, %s46_s12), 0  ;;  %p68_p12 = scmp.ne.s32.totalorder %s2097_s22, %s2093_s21 }
  0x87   : > { %2615 = sst [smem:[#allocation23_spill]] %s2640_s12  ;;  %p2331_p11 = por %p63_p3, %p62_p1 }
  0x88   : > { %s50_s14 = ssub.s32 %s2109_s25, %s2640_s12  ;;  %p206_p6 = scmp.eq.s32.totalorder %s2203_s27, 1 }
  0x89   : > { %p53_p13 = scmp.eq.s32.totalorder %s50_s14, 0  ;;  %p2617_p0 = scmp.eq.s32.totalorder %s2203_s27, 0 }
  0x8a   : > { %p2346_p4 = por %p206_p6, %p62_p1  ;;  %p212_p7 = scmp.eq.s32.totalorder %s1537_s17, 1 }
  0x8b   : > { %p2342_p2 = por %p2617_p0, %p68_p12  ;;  %p1750_p5 = scmp.lt.s32.totalorder %s2113_s26, 2 }
  0x8c   : > { %s2619_s16 = scalar_select %p2346_p4, 1, 0 }
  0x8d   : > { %s2618_s15 = scalar_select %p2342_p2, 1, 0 }
  0x8e   : > { %s2351_s18 = scalar_select %p53_p13, %s2101_s23, %s55_s7  }
  0x8f   : > { %p2353_p9 = por %p212_p7, %p68_p12  ;;  %s280_s20 = sand.u32 1, %s2101_s23  }
  0x90   : > { %s1545_s30 = sshll.u32 %s2109_s25, 7  ;;  %s2360_s10 = sshll.u32 %s280_s20, 3 }
  0x91   : > { %s2620_s19 = scalar_select %p2353_p9, 1, 0 }
  0x92   : > { %s2365_s8 = scalar_lea.hbm %s2592_s0, %s1545_s30  ;;  %s284_s9 = scalar_lea.vmem [#allocation5], %s2360_s10 }
  0x93   : > { %s292_s17 = sshll.u32 %s284_s9, 4  ;;  %p2370_p10 = pnand %p1750_p5, %p2331_p11  ;;  %s2374_s17 = int_to_ptr.vmem [resolvable:$true] %s292_s17 }
  0x94   : > { %s2379_s29 = scalar_lea.hbm %s2593_s1, %s1545_s30  ;;  %s281_s2 = scalar_lea.sflag [#allocation6], %s280_s20 }
  0x95   : > { %s1955_s3 = scalar_lea.hbm %s2365_s8, 128  ;;  %p1957_p1 = pneg %p2370_p10 }
  0x96   : > { %p1956_p8 = scmp.ne.s32.totalorder %s2365_s8, %s1955_s3  ;;  %s1960_s4 = scalar_lea.hbm %s2592_s0, 256 }
  0x97   : > { %p1961_p12 = scmp.lt.u32.totalorder %s2365_s8, %s2592_s0  ;;  %p1962_p6 = scmp.lt.u32.totalorder %s1960_s4, %s1955_s3 }
  0x98   : > { %p1958_p3 = pnand %p1957_p1, %p1956_p8  ;;  %p1964_p0 = scmp.lt.u32.totalorder %s1955_s3, %s2365_s8 }
  0x99   : > { %p1963_p13 = por %p1962_p6, %p1961_p12 }
  0x9a   : > { %p1959_p11 = pneg %p1958_p3 }
  0x9b   : > { %p1965_p7 = por %p1964_p0, %p1963_p13 }
  0x9d   : > { %p1966_p5 = pnand %p1965_p7, %p1959_p11 }
  0x9f   : > { %1969 = shalt.err (!%p1966_p5)
}
  0xa0   : > { %s1970_s20 = scalar_lea.vmem %s2374_s17, 128  ;;  %s2121_s30 = smov [#allocation5]  }
  0xa1   : > { %p1971_p8 = scmp.ne.s32.totalorder %s2374_s17, %s1970_s20  ;;  %s1975_s14 = sshll.u32 %s2121_s30, 4  ;;  %s1976_s14 = int_to_ptr.vmem [resolvable:$false] %s1975_s14 }
  0xa2   : > { %s1977_s5 = scalar_lea.vmem %s1976_s14, 256  ;;  %p1978_p4 = scmp.lt.s32.totalorder %s2374_s17, %s1976_s14 }
  0xa3   : > { %p1973_p3 = pnand %p1971_p8, %p1957_p1  ;;  %p1979_p12 = scmp.lt.s32.totalorder %s1977_s5, %s1970_s20 }
  0xa5   : > { %p1974_p9 = pneg %p1973_p3  ;;  %p1980_p6 = por %p1979_p12, %p1978_p4 }
  0xa7   : > { %p1981_p13 = pnand %p1980_p6, %p1974_p9 }
  0xa9   : > { %1984 = shalt.err (!%p1981_p13)
}
  0xaa   : > { %1738 = dma.hbm_to_vmem [thread:$0]  (!%p2370_p10), %s2365_s8, 128, %s2374_s17, %s281_s2  }
  0xab   : > { %s299_s3 = sand.u32 1, %s2113_s26   ;;  %s303_s4 = scalar_lea.vmem [#allocation8], %s2360_s10 }
  0xac   : > { %s311_s12 = sshll.u32 %s303_s4, 4  ;;  %s300_s11 = scalar_lea.sflag [#allocation9], %s299_s3  ;;  %s312_s12 = int_to_ptr.vmem [resolvable:$true] %s311_s12 }
  0xad   : > { %s1985_s13 = scalar_lea.hbm %s2379_s29, 128  ;;  %s1990_s30 = scalar_lea.hbm %s2593_s1, 256 }
  0xae   : > { %p1986_p4 = scmp.ne.s32.totalorder %s2379_s29, %s1985_s13  ;;  %p1991_p0 = scmp.lt.u32.totalorder %s2379_s29, %s2593_s1 }
  0xaf   : > { %p1992_p7 = scmp.lt.u32.totalorder %s1990_s30, %s1985_s13  ;;  %p1994_p8 = scmp.lt.u32.totalorder %s1985_s13, %s2379_s29 }
  0xb0   : > { %p1988_p9 = pnand %p1986_p4, %p1957_p1 }
  0xb1   : > { %p1993_p5 = por %p1992_p7, %p1991_p0 }
  0xb2   : > { %p1989_p11 = pneg %p1988_p9 }
  0xb3   : > { %p1995_p3 = por %p1994_p8, %p1993_p5 }
  0xb5   : > { %p1996_p12 = pnand %p1995_p3, %p1989_p11 }
  0xb7   : > { %1999 = shalt.err (!%p1996_p12)
}
  0xb8   : > { %s2000_s2 = scalar_lea.vmem %s312_s12, 128  ;;  %s2122_s10 = smov [#allocation8]  }
  0xb9   : > { %p2001_p6 = scmp.ne.s32.totalorder %s312_s12, %s2000_s2  ;;  %s2005_s8 = sshll.u32 %s2122_s10, 4  ;;  %s2006_s8 = int_to_ptr.vmem [resolvable:$false] %s2005_s8 }
  0xba   : > { %s2007_s17 = scalar_lea.vmem %s2006_s8, 256  ;;  %p2008_p9 = scmp.lt.s32.totalorder %s312_s12, %s2006_s8 }
  0xbb   : > { %p2003_p13 = pnand %p2001_p6, %p1957_p1  ;;  %p2009_p2 = scmp.lt.s32.totalorder %s2007_s17, %s2000_s2 }
  0xbd   : > { %p2004_p4 = pneg %p2003_p13  ;;  %p2010_p0 = por %p2009_p2, %p2008_p9 }
  0xbf   : > { %p2011_p7 = pnand %p2010_p0, %p2004_p4 }
  0xc1   : > { %2014 = shalt.err (!%p2011_p7)
}
  0xc2   : > { %1741 = dma.hbm_to_vmem [thread:$0]  (!%p2370_p10), %s2379_s29, 128, %s312_s12, %s300_s11  }
  0xc3   : > { %p2622_p11 = scmp.ne.s32.totalorder %s2608_s28, 0 }
  0xc4   : > { %s2430_s3 = sand.u32 (!%p2622_p11), 1, %s2097_s22   ;;  %p2623_p2 = scmp.ne.s32.totalorder (!%p2622_p11), %s2618_s15, 0 }
  0xc5   : > { %320 = sbr.rel (%p2622_p11) target bundleno = 1530 (0x5fa), region = 44  ;;  %s2433_s4 = sshll.u32 (!%p2622_p11), %s2430_s3, 3 }
  0xc6   : > { %s323_s13 = scalar_lea.sflag (!%p2622_p11), [#allocation6], %s2430_s3  ;;  %s326_s9 = scalar_lea.vmem (!%p2622_p11), [#allocation5], %s2433_s4 }
  0xcc   : > { %2068 = dma.done.wait (%p2623_p2), %s323_s13, 128  }
  0xcd   : > { %2070 = vsyncadd (%p2623_p2), %s323_s13, 4294967168  ;;  %s331_s28 = sand.u32 1, %s2203_s27   ;;  %s335_s29 = scalar_lea.vmem [#allocation8], %s2433_s4 }
  0xce   : > { %s332_s7 = scalar_lea.sflag [#allocation9], %s331_s28 }
  0xcf   : > { %2072 = dma.done.wait (%p2623_p2), %s332_s7, 128  }
  0xd0   : > { %2074 = vsyncadd (%p2623_p2), %s332_s7, 4294967168  ;;  %p2624_p10 = scmp.eq.s32.totalorder %s2203_s27, 0 }
  0xd2   : > { %2076 = dma.done.wait (%p2624_p10), [#allocation9], 512   ;;  %p2625_p1 = pmov %p2624_p10 }
  0xd4   : > { %2078 = vsyncadd (%p2625_p1), [#allocation9], 4294966784  ;;  %p2626_p5 = pmov %p2625_p1 }
  0xd5   : > { %p2627_p8 = pmov %p2625_p1 }
  0xd6   : > { %2080 = dma.done.wait (%p2626_p5), [#allocation12], 528  }
  0xd7   : > { %2082 = vsyncadd (%p2627_p8), [#allocation12], 4294966768  ;;  %p2628_p3 = pmov %p2625_p1 }
  0xd8   : > { %p2629_p12 = pmov %p2625_p1 }
  0xd9   : > { %2084 = dma.done.wait (%p2628_p3), [#allocation15], 16  }
  0xda   : > { %2086 = vsyncadd (%p2629_p12), [#allocation15], 4294967280  ;;  %v2123_v0 = vmov 0.0|0.0   ;;  %vm2124_vm0 = vmmov 0   ;;  %v2125_v1 = vmov 0.0   ;;  %vm401_vm1 = vcmask 261120  }
  0xdb   : > { %1682 = vmatprep.subr.bf16.mxu0 %v2123_v0  ;;  %1617 = vmatprep.mubr.msk.f32.mxu0 %vm2124_vm0, %v2125_v1  ;;  %494 = vst.msk [vmem:[#allocation4] sm:$0xff] %vm401_vm1, %v2125_v1  ;;  %v496_v2 = vld [vmem:[#allocation10] sm:$0xff]  ;;  %v497_v3 = vld [vmem:[#allocation10 + $0x8] sm:$0xff]  ;;  %v498_v4 = vld [vmem:[#allocation10 + $0x10] sm:$0xff]  ;;  %s2126_s27 = smov 96   ;;  %vm476_vm2 = vcmask 64512  }
  0xdc   : > { %1688 = vmatprep.subr.bf16.mxu1 %v2123_v0  ;;  %1628 = vmatprep.mubr.msk.f32.mxu1 %vm2124_vm0, %v2125_v1  ;;  %v1823_v5 = vpack.i.bf16 %v497_v3, %v496_v2  ;;  %v499_v6 = vld [vmem:[#allocation10 + $0x18] sm:$0xff]  ;;  %v1683_v7 = vpack.c.bf16 %v497_v3, %v496_v2  ;;  %v1558_v8 = vld [vmem:[#allocation11] ss:$0 sm:$0xff]  ;;  %s2127_s15 = smov 120   ;;  %s2128_s12 = smov 112   ;;  %vm1117_vm3 = vcmask 130112  }
  0xdd   : > { %v1828_v9 = vpack.i.bf16 %v499_v6, %v498_v4  ;;  %v1686_v10 = vpack.c.bf16 %v499_v6, %v498_v4  ;;  %522 = vrot.lane.b32.xlu1 %v1558_v8, %s2126_s27  ;;  %v389_v11 = vld [vmem:[%s326_s9] sm:$0xff]  ;;  %v495_v20 = vld [vmem:[%s335_s29] sm:$0xff]  ;;  %s2129_s11 = smov 104   ;;  %s2130_s20 = smov 88   ;;  %vm1201_vm4 = vcmask 195712   ;;  %vm1285_vm5 = vcmask 261312  }
  0xde   : > { %1824 = vrot.lane.b32.xlu0 %v1823_v5, %s2126_s27  ;;  %1684 = vmatpush3.bf16.msra.mxu0 %v1683_v7  ;;  %s2131_s30 = smov 80   ;;  %s2132_s14 = smov 72  }
  0xdf   : > { %1685 = vmatprep.subr.bf16.mxu0 %v2123_v0  ;;  %s2133_s5 = smov 8   ;;  %s2134_s2 = smov 24  }
  0xe0   : > { %s2135_s10 = smov 16   ;;  %s1575_s8 = sshll.u32 %s2105_s24, 7 }
  0xe1   : > { %s384_s17 = scalar_lea.vmem [#allocation16], %s2433_s4  ;;  %s2542_s7 = scalar_lea.hbm %s2598_s6, %s1575_s8 }
  0xe2   : > { %1829 = vrot.lane.b32.xlu0 %v1828_v9, %s2126_s27  ;;  %1687 = vmatpush3.bf16.msra.mxu0 %v1686_v10  ;;  %s1391_s13 = sshll.u32 %s384_s17, 4  ;;  %s1377_s29 = scalar_lea.sflag [#allocation7], %s2430_s3  ;;  %s2544_s13 = int_to_ptr.vmem [resolvable:$true] %s1391_s13 }
  0xe3   : > { %1641 = vmatprep.subr.mxu0 %v2125_v1  ;;  %p2630_p13 = scmp.ne.s32.totalorder %s2619_s16, 0  ;;  %s2136_s24 = smov [#allocation16]  }
  0xe4   : > { %s2019_s4 = sshll.u32 %s2136_s24, 4  ;;  %s2020_s4 = int_to_ptr.vmem [resolvable:$false] %s2019_s4 }
  0xe5   : > { %1618 = vmatmul.mubr.msk.f32.vlgmr.msra.gmra.mrb[0].mxu0 %vm401_vm1, %v389_v11  ;;  %p2022_p0 = scmp.lt.s32.totalorder %s2544_s13, %s2020_s4 }
  0xe6   : > { %1643 = vmatprep.mubr.msk.f32.mxu0 %vm2124_vm0, %v2125_v1 }
 0x14f   : > { %v523_v25 = vpop.permute.xlu1 %522 }
 0x150   : > { %v1825_v12 = vpop.permute.xlu0 %1824 }
 0x151   : > { %v1827_v13 = vunpack.i.h.bf16 %v1825_v12  ;;  %v1826_v14 = vunpack.i.l.bf16 %v1825_v12 }
 0x153   : > { %v1689_v15 = vpack.c.bf16 %v1827_v13, %v1826_v14 }
 0x154   : > { %v1830_v16 = vpop.permute.xlu0 %1829 }
 0x155   : > { %v1832_v17 = vunpack.i.h.bf16 %v1830_v16  ;;  %v1831_v18 = vunpack.i.l.bf16 %v1830_v16  ;;  %1690 = vmatpush3.bf16.msra.mxu1 %v1689_v15 }
 0x156   : > { %1691 = vmatprep.subr.bf16.mxu1 %v2123_v0 }
 0x157   : > { %v1692_v19 = vpack.c.bf16 %v1832_v17, %v1831_v18 }
 0x159   : > { %1693 = vmatpush3.bf16.msra.mxu1 %v1692_v19 }
 0x15a   : > { %1631 = vmatprep.subr.mxu1 %v2125_v1 }
 0x15c   : > { %1629 = vmatmul.mubr.msk.f32.vlgmr.msra.gmra.mrb[0].mxu1 %vm401_vm1, %v495_v20 }
 0x15d   : > { %1633 = vmatprep.mubr.msk.f32.mxu1 %vm2124_vm0, %v2125_v1 }
 0x1b8   : > { %v471_v21 = vpop.f32.mrb[0].mxu0 }
 0x1b9   : > { %v472_v22 = vadd.f32 %v1558_v8, %v471_v21  ;;  %v1619_v23 = vpop.f32.mrb[1].mxu0 }
 0x1bb   : > { %v475_v24 = vmul.f32 0.35355338, %v472_v22 }
 0x1bd   : > { %477 = vst.msk [vmem:[#allocation2] sm:$0xff] %vm476_vm2, %v475_v24  ;;  %479 = vrot.lane.b32.xlu1 %v475_v24, %s2127_s15  ;;  %484 = vrot.lane.b32.xlu0 %v475_v24, %s2128_s12 }
 0x1c1   : > { %489 = vrot.lane.b32.xlu1 %v475_v24, %s2129_s11  ;;  %v1032_v24 = vld [vmem:[#allocation4] sm:$0xff] }
 0x1c4   : > { %v599_v31 = vld [vmem:[#allocation2] sm:$0xff] }
 0x22f   : > { %v595_v26 = vpop.f32.mrb[0].mxu1  ;;  %v480_v27 = vpop.permute.xlu1 %479 }
 0x230   : > { %v596_v28 = vadd.f32 %v595_v26, %v523_v25  ;;  %v1630_v29 = vpop.f32.mrb[1].mxu1  ;;  %483 = vst.msk [vmem:[#allocation2 + $0x8] sm:$0xff] %vm476_vm2, %v480_v27  ;;  %v485_v30 = vpop.permute.xlu0 %484 }
 0x231   : > { %488 = vst.msk [vmem:[#allocation2 + $0x10] sm:$0xff] %vm476_vm2, %v485_v30 }
 0x232   : > { %1632 = vmatpush3.xpose.msk.msra.mxu1 %vm476_vm2, %v596_v28  ;;  %680 = vrot.lane.b32.xlu0 %v596_v28, %s2127_s15  ;;  %s2021_s15 = scalar_lea.vmem %s2020_s4, 256 }
 0x233   : > { %761 = vrot.lane.b32.xlu1 %v596_v28, %s2128_s12  ;;  %v490_v32 = vpop.permute.xlu1 %489  ;;  %1636 = vmatprep.subr.mxu1 %v2125_v1 }
 0x234   : > { %493 = vst.msk [vmem:[#allocation2 + $0x18] sm:$0xff] %vm476_vm2, %v490_v32 }
 0x235   : > { %1634 = vmatmul.mubr.msk.f32.vlgmr.msra.gmra.mrb[2].mxu1 %vm476_vm2, %v599_v31 }
 0x236   : > { %842 = vrot.lane.b32.xlu0 %v596_v28, %s2129_s11  ;;  %1638 = vmatprep.mubr.msk.f32.mxu1 %vm2124_vm0, %v2125_v1 }
 0x237   : > { %1035 = vrot.lane.b32.xlu1 %v596_v28, %s2130_s20  ;;  %v679_v35 = vld [vmem:[#allocation2 + $0x8] sm:$0xff] }
 0x238   : > { %v760_v36 = vld [vmem:[#allocation2 + $0x10] sm:$0xff] }
 0x23a   : > { %956 = vrot.lane.b32.xlu0 %v596_v28, %s2126_s27  ;;  %s2015_s27 = scalar_lea.vmem %s2544_s13, 128 }
 0x23b   : > { %1119 = vrot.lane.b32.xlu1 %v596_v28, %s2131_s30  ;;  %v841_v38 = vld [vmem:[#allocation2 + $0x18] sm:$0xff]  ;;  %p2016_p6 = scmp.ne.s32.totalorder %s2544_s13, %s2015_s27  ;;  %p2023_p7 = scmp.lt.s32.totalorder %s2021_s15, %s2015_s27 }
 0x23d   : > { %p2017_p4 = pnand %p2016_p6, %p2630_p13  ;;  %p2024_p11 = por %p2023_p7, %p2022_p0 }
 0x23e   : > { %1203 = vrot.lane.b32.xlu0 %v596_v28, %s2132_s14 }
 0x23f   : > { %p2018_p9 = pneg %p2017_p4 }
 0x241   : > { %p2025_p2 = pnand %p2024_p11, %p2018_p9 }
 0x2a4   : > { %v681_v33 = vpop.permute.xlu0 %680 }
 0x2a5   : > { %v762_v34 = vpop.permute.xlu1 %761  ;;  %1637 = vmatpush3.xpose.msk.msra.mxu1 %vm476_vm2, %v681_v33 }
 0x2a6   : > { %1642 = vmatpush3.xpose.msk.msra.mxu0 %vm476_vm2, %v762_v34  ;;  %1646 = vmatprep.subr.mxu1 %v2125_v1  ;;  %v1291_v34 = vld [vmem:[#allocation13] sm:$0xff] }
 0x2a7   : > { %1651 = vmatprep.subr.mxu0 %v2125_v1 }
 0x2a8   : > { %v843_v37 = vpop.permute.xlu0 %842  ;;  %1639 = vmatmul.mubr.msk.f32.vlgmr.msra.gmra.mrb[4].mxu1 %vm476_vm2, %v679_v35 }
 0x2a9   : > { %1644 = vmatmul.mubr.msk.f32.vlgmr.msra.gmra.mrb[2].mxu0 %vm476_vm2, %v760_v36  ;;  %1647 = vmatpush3.xpose.msk.msra.mxu1 %vm476_vm2, %v843_v37  ;;  %v1036_v39 = vpop.permute.xlu1 %1035  ;;  %v1293_v36 = vld [vmem:[#allocation13 + $0x10] sm:$0xff]  ;;  %v1294_v37 = vld [vmem:[#allocation13 + $0x18] sm:$0xff] }
 0x2aa   : > { %1648 = vmatprep.mubr.msk.f32.mxu1 %vm2124_vm0, %v2125_v1  ;;  %1656 = vmatprep.subr.mxu1 %v2125_v1 }
 0x2ab   : > { %1653 = vmatprep.mubr.msk.f32.mxu0 %vm2124_vm0, %v2125_v1 }
 0x2ac   : > { %v957_v40 = vpop.permute.xlu0 %956  ;;  %1649 = vmatmul.mubr.msk.f32.vlgmr.msra.gmra.mrb[6].mxu1 %vm476_vm2, %v841_v38  ;;  %v1698_v38 = vpack.c.bf16 %v1294_v37, %v1293_v36 }
 0x2ad   : > { %1652 = vmatpush3.msra.mxu0 %v957_v40  ;;  %1657 = vmatpush3.msra.mxu1 %v1036_v39  ;;  %v1120_v20 = vpop.permute.xlu1 %1119 }
 0x2ae   : > { %1658 = vmatprep.mubr.msk.f32.mxu1 %vm2124_vm0, %v2125_v1  ;;  %1661 = vmatprep.subr.mxu0 %v2125_v1 }
 0x2af   : > { %1666 = vmatprep.subr.mxu1 %v2125_v1 }
 0x2b0   : > { %v1204_v21 = vpop.permute.xlu0 %1203 }
 0x308   : > { %v673_v41 = vpop.f32.mrb[2].mxu1 }
 0x309   : > { %677 = vst.msk [vmem:[#allocation3] sm:$0xff] %vm476_vm2, %v673_v41  ;;  %v1635_v42 = vpop.f32.mrb[3].mxu1 }
 0x310   : > { %v921_v50 = vld [vmem:[#allocation3] sm:$0xff] }
 0x311   : > { %v925_v54 = vsel %vm476_vm2, %v921_v50, -inf }
 0x37b   : > { %v753_v43 = vpop.f32.mrb[4].mxu1 }
 0x37c   : > { %758 = vst.msk [vmem:[#allocation3 + $0x8] sm:$0xff] %vm476_vm2, %v753_v43  ;;  %v834_v44 = vpop.f32.mrb[2].mxu0  ;;  %v1640_v45 = vpop.f32.mrb[5].mxu1 }
 0x37d   : > { %839 = vst.msk [vmem:[#allocation3 + $0x10] sm:$0xff] %vm476_vm2, %v834_v44  ;;  %v1645_v46 = vpop.f32.mrb[3].mxu0 }
 0x37f   : > { %v915_v47 = vpop.f32.mrb[6].mxu1 }
 0x380   : > { %920 = vst.msk [vmem:[#allocation3 + $0x18] sm:$0xff] %vm476_vm2, %v915_v47  ;;  %v1650_v48 = vpop.f32.mrb[7].mxu1 }
 0x381   : > { %v1572_v48 = vld [vmem:[#allocation14] ss:$0 sm:$0xff] }
 0x383   : > { %v922_v49 = vld [vmem:[#allocation3 + $0x8] sm:$0xff] }
 0x384   : > { %v923_v51 = vld [vmem:[#allocation3 + $0x10] sm:$0xff]  ;;  %v926_v52 = vsel %vm476_vm2, %v922_v49, -inf }
 0x385   : > { %v927_v55 = vsel %vm476_vm2, %v923_v51, -inf  ;;  %v929_v57 = vmax.f32 %v925_v54, %v926_v52 }
 0x387   : > { %v924_v53 = vld [vmem:[#allocation3 + $0x18] sm:$0xff] }
 0x388   : > { %v928_v56 = vsel %vm476_vm2, %v924_v53, -inf }
 0x389   : > { %v930_v58 = vmax.f32 %v927_v55, %v928_v56 }
 0x38b   : > { %v931_v59 = vmax.f32 %v929_v57, %v930_v58 }
 0x38d   : > { %v932_v60 = vsub.f32 %v921_v50, %v931_v59  ;;  %v933_v61 = vsub.f32 %v922_v49, %v931_v59  ;;  %v934_v62 = vsub.f32 %v923_v51, %v931_v59  ;;  %v935_v63 = vsub.f32 %v924_v53, %v931_v59 }
 0x38f   : > { %v936_v2 = vmul.f32 1.442695, %v932_v60  ;;  %v938_v3 = vmul.f32 1.442695, %v933_v61  ;;  %v940_v4 = vmul.f32 1.442695, %v934_v62 }
 0x390   : > { %v942_v5 = vmul.f32 1.442695, %v935_v63 }
 0x391   : > { %1833 = vpow2.f32 %v936_v2 }
 0x392   : > { %1835 = vpow2.f32 %v938_v3 }
 0x393   : > { %1837 = vpow2.f32 %v940_v4 }
 0x394   : > { %1839 = vpow2.f32 %v942_v5 }
 0x39b   : > { %v1834_v6 = vpop.eup %1833 }
 0x39c   : > { %v1836_v7 = vpop.eup %1835  ;;  %v944_v8 = vsel %vm476_vm2, %v1834_v6, 0.0 }
 0x39d   : > { %v1838_v9 = vpop.eup %1837  ;;  %v945_v10 = vsel %vm476_vm2, %v1836_v7, 0.0 }
 0x39e   : > { %v1840_v11 = vpop.eup %1839  ;;  %v946_v12 = vadd.f32 %v945_v10, %v944_v8  ;;  %v947_v13 = vsel %vm476_vm2, %v1838_v9, 0.0 }
 0x39f   : > { %v949_v15 = vsel %vm476_vm2, %v1840_v11, 0.0 }
 0x3a0   : > { %v948_v14 = vadd.f32 %v947_v13, %v946_v12 }
 0x3a2   : > { %v950_v16 = vadd.f32 %v949_v15, %v948_v14 }
 0x3a4   : > { %1841 = vrcp.f32 %v950_v16 }
 0x3ae   : > { %v1842_v17 = vpop.eup %1841 }
 0x3af   : > { %v952_v18 = vmul.f32 %v1842_v17, %v1834_v6  ;;  %v953_v19 = vmul.f32 %v1842_v17, %v1836_v7  ;;  %v954_v22 = vmul.f32 %v1842_v17, %v1838_v9  ;;  %v955_v23 = vmul.f32 %v1842_v17, %v1840_v11 }
 0x3b1   : > { %1654 = vmatmul.mubr.msk.f32.vlgmr.msra.gmra.mrb[4].mxu0 %vm476_vm2, %v952_v18  ;;  %1659 = vmatmul.mubr.msk.f32.vlgmr.msra.gmra.mrb[8].mxu1 %vm476_vm2, %v953_v19 }
 0x3b2   : > { %1662 = vmatpush3.msra.mxu0 %v1120_v20  ;;  %1667 = vmatpush3.msra.mxu1 %v1204_v21 }
 0x3b3   : > { %1663 = vmatprep.mubr.msk.f32.mxu0 %vm2124_vm0, %v2125_v1  ;;  %1668 = vmatprep.mubr.msk.f32.mxu1 %vm2124_vm0, %v2125_v1 }
 0x3b4   : > { %1694 = vmatprep.subr.bf16.mxu0 %v2123_v0 }
 0x3b5   : > { %1664 = vmatmul.mubr.msk.f32.vlgmr.msra.gmra.mrb[6].mxu0 %vm476_vm2, %v954_v22  ;;  %1669 = vmatmul.mubr.msk.f32.vlgmr.msra.gmra.mrb[10].mxu1 %vm476_vm2, %v955_v23 }
 0x3b6   : > { %1679 = vmatprep.mubr.msk.f32.mxu0 %vm2124_vm0, %v2125_v1  ;;  %v1292_v1 = vld [vmem:[#allocation13 + $0x8] sm:$0xff] }
 0x3b7   : > { %v1695_v35 = vpack.c.bf16 %v1292_v1, %v1291_v34 }
 0x3b9   : > { %1696 = vmatpush3.bf16.msra.mxu0 %v1695_v35 }
 0x3ba   : > { %1697 = vmatprep.subr.bf16.mxu0 %v2123_v0 }
 0x3bd   : > { %1699 = vmatpush3.bf16.msra.mxu0 %v1698_v38 }
 0x484   : > { %v1028_v25 = vpop.f32.mrb[4].mxu0  ;;  %v1107_v26 = vpop.f32.mrb[8].mxu1 }
 0x485   : > { %v1033_v27 = vadd.f32 %v1032_v24, %v1028_v25  ;;  %1113 = vrot.lane.b32.xlu1 %v1107_v26, %s2133_s5  ;;  %v1655_v28 = vpop.f32.mrb[5].mxu0  ;;  %v1660_v29 = vpop.f32.mrb[9].mxu1 }
 0x487   : > { %1034 = vst.msk [vmem:[#allocation4] sm:$0xff] %vm476_vm2, %v1033_v27 }
 0x488   : > { %v1191_v30 = vpop.f32.mrb[6].mxu0  ;;  %v1275_v31 = vpop.f32.mrb[10].mxu1 }
 0x489   : > { %1281 = vrot.lane.b32.xlu1 %v1275_v31, %s2134_s2  ;;  %v1670_v32 = vpop.f32.mrb[11].mxu1  ;;  %1197 = vrot.lane.b32.xlu0 %v1191_v30, %s2135_s10  ;;  %v1665_v33 = vpop.f32.mrb[7].mxu0 }
 0x48e   : > { %v1111_v40 = vld [vmem:[#allocation4] sm:$0xff] }
 0x4f7   : > { %v1114_v39 = vpop.permute.xlu1 %1113 }
 0x4f8   : > { %v1116_v41 = vadd.f32 %v1114_v39, %v1111_v40 }
 0x4fa   : > { %1118 = vst.msk [vmem:[#allocation4] sm:$0xff] %vm1117_vm3, %v1116_v41 }
 0x4fb   : > { %v1198_v43 = vpop.permute.xlu0 %1197  ;;  %v1282_v45 = vpop.permute.xlu1 %1281 }
 0x501   : > { %v1195_v42 = vld [vmem:[#allocation4] sm:$0xff] }
 0x502   : > { %v1200_v44 = vadd.f32 %v1198_v43, %v1195_v42 }
 0x504   : > { %1202 = vst.msk [vmem:[#allocation4] sm:$0xff] %vm1201_vm4, %v1200_v44 }
 0x50b   : > { %v1279_v46 = vld [vmem:[#allocation4] sm:$0xff] }
 0x50c   : > { %v1284_v47 = vadd.f32 %v1282_v45, %v1279_v46 }
 0x50e   : > { %1286 = vst.msk [vmem:[#allocation4] sm:$0xff] %vm1285_vm5, %v1284_v47 }
 0x515   : > { %v1290_v0 = vld [vmem:[#allocation4] sm:$0xff] }
 0x516   : > { %1680 = vmatmul.mubr.msk.f32.vlgmr.msra.gmra.mrb[8].mxu0 %vm401_vm1, %v1290_v0 }
 0x5e9   : > { %v1371_v49 = vpop.f32.mrb[8].mxu0 }
 0x5ea   : > { %v1372_v50 = vadd.f32 %v1572_v48, %v1371_v49  ;;  %v1681_v51 = vpop.f32.mrb[9].mxu0 }
 0x5ec   : > { %1375 = vst.msk [vmem:[%s384_s17] sm:$0xff] %vm401_vm1, %v1372_v50 }
 0x5ed   : > { %2028 = shalt.err (!%p2025_p2)
}
 0x5ee   : > { %s2029_s3 = scalar_lea.hbm %s2542_s7, 128  ;;  %s2033_s20 = scalar_lea.hbm %s2598_s6, 256 }
 0x5ef   : > { %p2030_p10 = scmp.ne.s32.totalorder %s2542_s7, %s2029_s3  ;;  %p2034_p8 = scmp.lt.u32.totalorder %s2542_s7, %s2598_s6 }
 0x5f0   : > { %p2035_p3 = scmp.lt.u32.totalorder %s2033_s20, %s2029_s3  ;;  %p2037_p6 = scmp.lt.u32.totalorder %s2029_s3, %s2542_s7 }
 0x5f1   : > { %p2031_p1 = pnand %p2030_p10, %p2630_p13 }
 0x5f2   : > { %p2036_p12 = por %p2035_p3, %p2034_p8 }
 0x5f3   : > { %p2032_p5 = pneg %p2031_p1 }
 0x5f4   : > { %p2038_p4 = por %p2037_p6, %p2036_p12 }
 0x5f6   : > { %p2039_p9 = pnand %p2038_p4, %p2032_p5 }
 0x5f8   : > { %2042 = shalt.err (!%p2039_p9)
}
 0x5f9   : > { %1720 = dma.vmem_to_hbm [thread:$0]  (%p2630_p13), %s2544_s13, 128, %s2542_s7, %s1377_s29  }
 0x5fa PF: > { %s1403_s5 = sand.u32 1, %s2093_s21   ;;  %p2631_p0 = scmp.ne.s32.totalorder %s2620_s19, 0 }
 0x5fb   : > { %p2632_p7 = scmp.ge.s32.totalorder %s2113_s26, 2  ;;  %s1404_s2 = scalar_lea.sflag [#allocation7], %s1403_s5 }
 0x5fd   : > { %p1743_p11 = pnand %p2632_p7, %p2631_p0 }
 0x5ff   : > { %2088 = dma.done.wait (!%p1743_p11), %s1404_s2, 128  }
 0x600   : > { %2090 = vsyncadd (!%p1743_p11), %s1404_s2, 4294967168  ;;  %s27_s26 = sadd.s32 1, %s2113_s26   ;;  %s2633_s16 = sld [smem:[#allocation23_spill]] }
 0x601   : > { %p24_p2 = scmp.ge.s32.totalorder %s27_s26, 4   ;;  %s2634_s21 = smov %s2097_s22 }
 0x602   : > { %s2635_s22 = smov %s2101_s23  ;;  %s2636_s23 = smov %s2351_s18 }
 0x603   : > { %s2637_s24 = smov %s2109_s25  ;;  %26 = sbr.rel (!%p24_p2) target bundleno = 15 (0xf), region = 135 }
 0x606   : > { %s2638_s25 = smov %s2633_s16 }
 0x60a   :  { %1409 = vsyncpa [#allocation6], 1 }
 0x60b   :  { %1411 = vsyncpa [#allocation6 + $0x1], 1 }
 0x60c   :  { %1412 = vsyncpa [#allocation9], 1 }
 0x60d   :  { %1414 = vsyncpa [#allocation9 + $0x1], 1 }
 0x60e   :  { %1415 = vsyncpa [#allocation12], 1 }
 0x60f   :  { %1416 = vsyncpa [#allocation15], 1 }
 0x610   :  { %1417 = vsyncpa [#allocation7], 1 }
 0x611   :  { %1419 = vsyncpa [#allocation7 + $0x1], 1 }

</bundles_post_ra>
